<compile_context>
chip_gen: v7x
topology: tpu7x:2x2x1
jax: 0.10.0
libtpu: 0.0.40
codegen_flags: <defaults>
</compile_context>

<pallas_src>
import functools

import jax
import jax.numpy as jnp
from jax import lax
from jax.experimental import pallas as pl
from jax.experimental.pallas import tpu as pltpu


def _mismatch_kernel(skip_ref, t_ref, x_ref, out_ref, g_bg_ref, g_fg_ref, *, H, W):
    """One (image j, class c) slice per grid step: grid = (B, C)."""
    N = float(H * W)
    BIG = jnp.float32(1e9)  # >> max possible squared distance, << f32 overflow

    j = pl.program_id(0)
    c = pl.program_id(1)

    out_lane = lax.broadcasted_iota(jnp.int32, (1, 128), 1)
    # Skipped classes contribute exactly 0 (and the block is fresh every step).
    out_ref[0, 0] = jnp.zeros((1, 128), jnp.float32)

    # Scalar-prefetched skip flag (SMEM): max(target)==0 and max(max_positiones)==0.
    skip = skip_ref[j, c] != 0

    @pl.when(jnp.logical_not(skip))
    def _():
        t2 = t_ref[0, 0].astype(jnp.float32)                      # (H, W) target
        x = x_ref[0, 0].astype(jnp.float32)                       # (H, W) net_out

        rows = lax.broadcasted_iota(jnp.int32, (H, W), 0)
        cols = lax.broadcasted_iota(jnp.int32, (H, W), 1)
        rows_f = rows.astype(jnp.float32)

        # posmask = target.astype(uint8).astype(bool)  (truncating cast).
        fg = (t2.astype(jnp.int32) != 0).astype(jnp.float32)
        bg = 1.0 - fg

        def col_minpass(pen):
            """g[r, c] = min_{c'} (c - c')^2 + pen[r, c'] as a running elementwise
            min over column offsets (in-bounds-masked lane rolls); O(H*W) live.
            NOTE: static unroll is fine at small W; use a scan form for large W."""
            g = pen
            for o in range(1, W):
                o2 = jnp.float32(o * o)
                left = jnp.where(cols >= o,
                                 pltpu.roll(pen, shift=o, axis=1), BIG)
                right = jnp.where(cols <= W - 1 - o,
                                  pltpu.roll(pen, shift=W - o, axis=1), BIG)
                g = jnp.minimum(g, jnp.minimum(left, right) + o2)
            return g

        def row_minpass(g_ref):
            """d2[r, c] = min_{r'} (r - r')^2 + g[r', c]: fori_loop running min
            over the leading (sublane) axis - pure VPU adds/mins, no XLU reduce,
            one dynamic (1, W) row load per iteration."""
            def body(k, acc):
                d = rows_f - k.astype(jnp.float32)
                return jnp.minimum(acc, d * d + g_ref[pl.ds(k, 1), :])
            return lax.fori_loop(0, H, body,
                                 jnp.full((H, W), BIG, jnp.float32),
                                 unroll=(H <= 32))

        def sq_edt(src, g_ref):
            """Exact squared EDT to the nearest pixel where src == 1 (separable)."""
            pen = (1.0 - src) * BIG
            g_ref[...] = col_minpass(pen)
            return row_minpass(g_ref)

        posdis = jnp.sqrt(sq_edt(bg, g_bg_ref))   # distance to nearest background
        negdis = jnp.sqrt(sq_edt(fg, g_fg_ref))   # distance to nearest foreground
        # TODO(synk): scipy distance_transform_edt semantics for an all-foreground
        # / all-background slice (no opposite-class pixel) are not reproduced;
        # distances saturate at sqrt(1e9) instead.

        # Inner boundary (skimage find_boundaries mode='inner', 4-connectivity):
        # foreground pixel with at least one in-image background 4-neighbor.
        # pltpu.roll needs non-negative shifts: shift = size-1 == circular -1.
        nb = jnp.where(cols < W - 1, pltpu.roll(bg, shift=W - 1, axis=1), 0.0)
        nb = nb + jnp.where(cols > 0, pltpu.roll(bg, shift=1, axis=1), 0.0)
        nb = nb + jnp.where(rows < H - 1, pltpu.roll(bg, shift=H - 1, axis=0), 0.0)
        nb = nb + jnp.where(rows > 0, pltpu.roll(bg, shift=1, axis=0), 0.0)
        boundary = jnp.logical_and(fg > 0.0, nb > 0.0)

        # Signed distance map (zero on boundary); boundary_loss = mean(sdf * x).
        sdf = jnp.where(boundary, 0.0, negdis - posdis)
        loss = jnp.sum(sdf * x) * jnp.float32(1.0 / N)

        out_ref[0, 0] = jnp.where(out_lane == 0, loss, 0.0)


@jax.jit
def mismatch_loss(net_out, target, max_positiones):
    B, C, H, W = target.shape

    # Per-(image, class) skip flags -> SMEM scalar-prefetch table.  This replaces
    # DMA-ing the full max_positiones slab (and the in-kernel target max) entirely.
    skip = jnp.logical_and(
        jnp.max(target.reshape(B, C, H * W), axis=-1) == 0,
        jnp.max(max_positiones.reshape(B, C, H * W), axis=-1) == 0,
    ).astype(jnp.int32)                                           # (B, C)

    kernel = functools.partial(_mismatch_kernel, H=H, W=W)

    # Size VMEM from the actual footprint: 2 inputs x 2 pipeline buffers x tile,
    # 2 EDT scratch tiles, ~2 dozen live (H, W) f32 working values; cap at 48 MiB
    # so the same limit remains safe on v7x (64 MiB physical VMEM).
    tile_bytes = H * W * 4
    vmem_bytes = int(min(48 * 1024 * 1024,
                         max(16 * 1024 * 1024, 40 * tile_bytes)))

    per_class = pl.pallas_call(
        kernel,
        out_shape=jax.ShapeDtypeStruct((B, C, 1, 128), jnp.float32),
        grid_spec=pltpu.PrefetchScalarGridSpec(
            num_scalar_prefetch=1,
            grid=(B, C),
            in_specs=[
                pl.BlockSpec((1, 1, H, W), lambda j, c, skips: (j, c, 0, 0)),  # target
                pl.BlockSpec((1, 1, H, W), lambda j, c, skips: (j, c, 0, 0)),  # net_out
            ],
            out_specs=pl.BlockSpec((1, 1, 1, 128),
                                   lambda j, c, skips: (j, c, 0, 0)),
            scratch_shapes=[
                pltpu.VMEM((H, W), jnp.float32),   # EDT column-pass result (bg)
                pltpu.VMEM((H, W), jnp.float32),   # EDT column-pass result (fg)
            ],
        ),
        compiler_params=pltpu.CompilerParams(
            dimension_semantics=("parallel", "parallel"),
            vmem_limit_bytes=vmem_bytes),
    )(skip, target, net_out)

    losses = per_class[:, :, 0, 0]                                # (B, C)
    # Matches torch: losses.sum() / count_nonzero(losses)  (0/0 -> nan, as torch).
    counts = jnp.count_nonzero(losses, axis=1).astype(jnp.float32)
    img_losses = jnp.sum(losses, axis=1) / counts                 # (B,)
    return jnp.sum(img_losses) / jnp.float32(B)


if __name__ == "__main__":
    key = jax.random.PRNGKey(0)
    k1, k2, k3 = jax.random.split(key, 3)
    B, C, H, W = 2, 4, 16, 16

    net_out = jax.random.normal(k1, (B, C, H, W), dtype=jnp.float32)
    target = (jax.random.uniform(k2, (B, C, H, W)) < 0.35).astype(jnp.float32)
    # guarantee every class slice has both foreground and background pixels
    target = target.at[:, :, 0, 0].set(1.0).at[:, :, H - 1, W - 1].set(0.0)
    max_positiones = (jax.random.uniform(k3, (B, C, H, W)) < 0.5).astype(jnp.float32)

    out = mismatch_loss(net_out, target, max_positiones)
    jax.block_until_ready(out)
    print("KERNEL_OK")
</pallas_src>

<mosaic_0001>
module attributes {stable_mosaic.version = 11 : i64} {
  func.func @_mismatch_kernel(%arg0: i32, %arg1: i32, %arg2: memref<2x4xi32, #tpu.memory_space<smem>>, %arg3: memref<1x1x16x16xf32, #tpu.memory_space<vmem>>, %arg4: memref<1x1x16x16xf32, #tpu.memory_space<vmem>>, %arg5: memref<1x1x1x128xf32, #tpu.memory_space<vmem>>, %arg6: memref<16x16xf32, #tpu.memory_space<vmem>>, %arg7: memref<16x16xf32, #tpu.memory_space<vmem>>) attributes {dimension_semantics = [#tpu.dimension_semantics<parallel>, #tpu.dimension_semantics<parallel>], iteration_bounds = array<i64: 2, 4>, scalar_prefetch = 1 : i64, scratch_operands = 2 : i64, tpu.core_type = #tpu.core_type<tc>, window_params = [{transform_indices = @transform_0, window_bounds = array<i64: 1, 1, 16, 16>}, {transform_indices = @transform_1, window_bounds = array<i64: 1, 1, 16, 16>}, {transform_indices = @transform_2, window_bounds = array<i64: 1, 1, 1, 128>}]} {
    %0 = tpu.iota {dimensions = array<i32: 1>} : vector<1x128xi32>
    %cst = arith.constant 0.000000e+00 : f32
    %1 = vector.broadcast %cst : f32 to vector<1x128xf32>
    %c0 = arith.constant 0 : index
    %c0_0 = arith.constant 0 : index
    %c0_1 = arith.constant 0 : index
    %c0_2 = arith.constant 0 : index
    %2 = vector.load %arg5[%c0, %c0_0, %c0_1, %c0_2] : memref<1x1x1x128xf32, #tpu.memory_space<vmem>>, vector<1x1x1x128xf32>
    %3 = vector.shape_cast %2 : vector<1x1x1x128xf32> to vector<1x128xf32>
    %4 = vector.shape_cast %1 : vector<1x128xf32> to vector<1x1x1x128xf32>
    tpu.vector_store %arg5[%c0, %c0_0, %c0_1, %c0_2], %4 {strides = array<i32>} : memref<1x1x1x128xf32, #tpu.memory_space<vmem>>, vector<1x1x1x128xf32>,
    %5 = arith.index_cast %arg0 : i32 to index
    %6 = arith.index_cast %arg1 : i32 to index
    %7 = memref.load %arg2[%5, %6] : memref<2x4xi32, #tpu.memory_space<smem>>
    %c0_i32 = arith.constant 0 : i32
    %8 = arith.cmpi ne, %7, %c0_i32 : i32
    %true = arith.constant true
    %9 = arith.xori %8, %true : i1
    %10 = arith.extui %9 : i1 to i32
    %cst_3 = arith.constant 1.000000e+09 : f32
    %c0_i32_4 = arith.constant 0 : i32
    %11 = arith.cmpi ne, %10, %c0_i32_4 : i32
    scf.if %11 {
      %c0_5 = arith.constant 0 : index
      %c0_6 = arith.constant 0 : index
      %c0_7 = arith.constant 0 : index
      %c0_8 = arith.constant 0 : index
      %12 = vector.load %arg3[%c0_5, %c0_6, %c0_7, %c0_8] : memref<1x1x16x16xf32, #tpu.memory_space<vmem>>, vector<1x1x16x16xf32>
      %13 = vector.shape_cast %12 : vector<1x1x16x16xf32> to vector<16x16xf32>
      %c0_9 = arith.constant 0 : index
      %c0_10 = arith.constant 0 : index
      %c0_11 = arith.constant 0 : index
      %c0_12 = arith.constant 0 : index
      %14 = vector.load %arg4[%c0_9, %c0_10, %c0_11, %c0_12] : memref<1x1x16x16xf32, #tpu.memory_space<vmem>>, vector<1x1x16x16xf32>
      %15 = vector.shape_cast %14 : vector<1x1x16x16xf32> to vector<16x16xf32>
      %16 = tpu.iota {dimensions = array<i32: 0>} : vector<16x16xi32>
      %17 = tpu.iota {dimensions = array<i32: 1>} : vector<16x16xi32>
      %18 = arith.sitofp %16 : vector<16x16xi32> to vector<16x16xf32>
      %19 = arith.fptosi %13 : vector<16x16xf32> to vector<16x16xi32>
      %c0_i32_13 = arith.constant 0 : i32
      %20 = vector.broadcast %c0_i32_13 : i32 to vector<16x16xi32>
      %21 = arith.cmpi ne, %19, %20 : vector<16x16xi32>
      %22 = arith.extui %21 : vector<16x16xi1> to vector<16x16xi32>
      %23 = arith.sitofp %22 : vector<16x16xi32> to vector<16x16xf32>
      %cst_14 = arith.constant 1.000000e+00 : f32
      %24 = vector.broadcast %cst_14 : f32 to vector<16x16xf32>
      %25 = arith.subf %24, %23 : vector<16x16xf32>
      %cst_15 = arith.constant 1.000000e+00 : f32
      %26 = vector.broadcast %cst_15 : f32 to vector<16x16xf32>
      %27 = arith.subf %26, %25 : vector<16x16xf32>
      %28 = vector.broadcast %cst_3 : f32 to vector<16x16xf32>
      %29 = arith.mulf %27, %28 : vector<16x16xf32>
      %c1_i32 = arith.constant 1 : i32
      %30 = vector.broadcast %c1_i32 : i32 to vector<16x16xi32>
      %31 = arith.cmpi sge, %17, %30 : vector<16x16xi32>
      %c1_i32_16 = arith.constant 1 : i32
      %32 = tpu.dynamic_rotate %29 by %c1_i32_16 dim 1 : vector<16x16xf32>, i32 -> vector<16x16xf32>
      %33 = vector.broadcast %cst_3 : f32 to vector<16x16xf32>
      %34 = arith.select %31, %32, %33 : vector<16x16xi1>, vector<16x16xf32>
      %c14_i32 = arith.constant 14 : i32
      %35 = vector.broadcast %c14_i32 : i32 to vector<16x16xi32>
      %36 = arith.cmpi sle, %17, %35 : vector<16x16xi32>
      %c15_i32 = arith.constant 15 : i32
      %37 = tpu.dynamic_rotate %29 by %c15_i32 dim 1 : vector<16x16xf32>, i32 -> vector<16x16xf32>
      %38 = vector.broadcast %cst_3 : f32 to vector<16x16xf32>
      %39 = arith.select %36, %37, %38 : vector<16x16xi1>, vector<16x16xf32>
      %40 = arith.minimumf %34, %39 : vector<16x16xf32>
      %cst_17 = arith.constant 1.000000e+00 : f32
      %41 = vector.broadcast %cst_17 : f32 to vector<16x16xf32>
      %42 = arith.addf %40, %41 : vector<16x16xf32>
      %43 = arith.minimumf %29, %42 : vector<16x16xf32>
      %c2_i32 = arith.constant 2 : i32
      %44 = vector.broadcast %c2_i32 : i32 to vector<16x16xi32>
      %45 = arith.cmpi sge, %17, %44 : vector<16x16xi32>
      %c2_i32_18 = arith.constant 2 : i32
      %46 = tpu.dynamic_rotate %29 by %c2_i32_18 dim 1 : vector<16x16xf32>, i32 -> vector<16x16xf32>
      %47 = vector.broadcast %cst_3 : f32 to vector<16x16xf32>
      %48 = arith.select %45, %46, %47 : vector<16x16xi1>, vector<16x16xf32>
      %c13_i32 = arith.constant 13 : i32
      %49 = vector.broadcast %c13_i32 : i32 to vector<16x16xi32>
      %50 = arith.cmpi sle, %17, %49 : vector<16x16xi32>
      %c14_i32_19 = arith.constant 14 : i32
      %51 = tpu.dynamic_rotate %29 by %c14_i32_19 dim 1 : vector<16x16xf32>, i32 -> vector<16x16xf32>
      %52 = vector.broadcast %cst_3 : f32 to vector<16x16xf32>
      %53 = arith.select %50, %51, %52 : vector<16x16xi1>, vector<16x16xf32>
      %54 = arith.minimumf %48, %53 : vector<16x16xf32>
      %cst_20 = arith.constant 4.000000e+00 : f32
      %55 = vector.broadcast %cst_20 : f32 to vector<16x16xf32>
      %56 = arith.addf %54, %55 : vector<16x16xf32>
      %57 = arith.minimumf %43, %56 : vector<16x16xf32>
      %c3_i32 = arith.constant 3 : i32
      %58 = vector.broadcast %c3_i32 : i32 to vector<16x16xi32>
      %59 = arith.cmpi sge, %17, %58 : vector<16x16xi32>
      %c3_i32_21 = arith.constant 3 : i32
      %60 = tpu.dynamic_rotate %29 by %c3_i32_21 dim 1 : vector<16x16xf32>, i32 -> vector<16x16xf32>
      %61 = vector.broadcast %cst_3 : f32 to vector<16x16xf32>
      %62 = arith.select %59, %60, %61 : vector<16x16xi1>, vector<16x16xf32>
      %c12_i32 = arith.constant 12 : i32
      %63 = vector.broadcast %c12_i32 : i32 to vector<16x16xi32>
      %64 = arith.cmpi sle, %17, %63 : vector<16x16xi32>
      %c13_i32_22 = arith.constant 13 : i32
      %65 = tpu.dynamic_rotate %29 by %c13_i32_22 dim 1 : vector<16x16xf32>, i32 -> vector<16x16xf32>
      %66 = vector.broadcast %cst_3 : f32 to vector<16x16xf32>
      %67 = arith.select %64, %65, %66 : vector<16x16xi1>, vector<16x16xf32>
      %68 = arith.minimumf %62, %67 : vector<16x16xf32>
      %cst_23 = arith.constant 9.000000e+00 : f32
      %69 = vector.broadcast %cst_23 : f32 to vector<16x16xf32>
      %70 = arith.addf %68, %69 : vector<16x16xf32>
      %71 = arith.minimumf %57, %70 : vector<16x16xf32>
      %c4_i32 = arith.constant 4 : i32
      %72 = vector.broadcast %c4_i32 : i32 to vector<16x16xi32>
      %73 = arith.cmpi sge, %17, %72 : vector<16x16xi32>
      %c4_i32_24 = arith.constant 4 : i32
      %74 = tpu.dynamic_rotate %29 by %c4_i32_24 dim 1 : vector<16x16xf32>, i32 -> vector<16x16xf32>
      %75 = vector.broadcast %cst_3 : f32 to vector<16x16xf32>
      %76 = arith.select %73, %74, %75 : vector<16x16xi1>, vector<16x16xf32>
      %c11_i32 = arith.constant 11 : i32
      %77 = vector.broadcast %c11_i32 : i32 to vector<16x16xi32>
      %78 = arith.cmpi sle, %17, %77 : vector<16x16xi32>
      %c12_i32_25 = arith.constant 12 : i32
      %79 = tpu.dynamic_rotate %29 by %c12_i32_25 dim 1 : vector<16x16xf32>, i32 -> vector<16x16xf32>
      %80 = vector.broadcast %cst_3 : f32 to vector<16x16xf32>
      %81 = arith.select %78, %79, %80 : vector<16x16xi1>, vector<16x16xf32>
      %82 = arith.minimumf %76, %81 : vector<16x16xf32>
      %cst_26 = arith.constant 1.600000e+01 : f32
      %83 = vector.broadcast %cst_26 : f32 to vector<16x16xf32>
      %84 = arith.addf %82, %83 : vector<16x16xf32>
      %85 = arith.minimumf %71, %84 : vector<16x16xf32>
      %c5_i32 = arith.constant 5 : i32
      %86 = vector.broadcast %c5_i32 : i32 to vector<16x16xi32>
      %87 = arith.cmpi sge, %17, %86 : vector<16x16xi32>
      %c5_i32_27 = arith.constant 5 : i32
      %88 = tpu.dynamic_rotate %29 by %c5_i32_27 dim 1 : vector<16x16xf32>, i32 -> vector<16x16xf32>
      %89 = vector.broadcast %cst_3 : f32 to vector<16x16xf32>
      %90 = arith.select %87, %88, %89 : vector<16x16xi1>, vector<16x16xf32>
      %c10_i32 = arith.constant 10 : i32
      %91 = vector.broadcast %c10_i32 : i32 to vector<16x16xi32>
      %92 = arith.cmpi sle, %17, %91 : vector<16x16xi32>
      %c11_i32_28 = arith.constant 11 : i32
      %93 = tpu.dynamic_rotate %29 by %c11_i32_28 dim 1 : vector<16x16xf32>, i32 -> vector<16x16xf32>
      %94 = vector.broadcast %cst_3 : f32 to vector<16x16xf32>
      %95 = arith.select %92, %93, %94 : vector<16x16xi1>, vector<16x16xf32>
      %96 = arith.minimumf %90, %95 : vector<16x16xf32>
      %cst_29 = arith.constant 2.500000e+01 : f32
      %97 = vector.broadcast %cst_29 : f32 to vector<16x16xf32>
      %98 = arith.addf %96, %97 : vector<16x16xf32>
      %99 = arith.minimumf %85, %98 : vector<16x16xf32>
      %c6_i32 = arith.constant 6 : i32
      %100 = vector.broadcast %c6_i32 : i32 to vector<16x16xi32>
      %101 = arith.cmpi sge, %17, %100 : vector<16x16xi32>
      %c6_i32_30 = arith.constant 6 : i32
      %102 = tpu.dynamic_rotate %29 by %c6_i32_30 dim 1 : vector<16x16xf32>, i32 -> vector<16x16xf32>
      %103 = vector.broadcast %cst_3 : f32 to vector<16x16xf32>
      %104 = arith.select %101, %102, %103 : vector<16x16xi1>, vector<16x16xf32>
      %c9_i32 = arith.constant 9 : i32
      %105 = vector.broadcast %c9_i32 : i32 to vector<16x16xi32>
      %106 = arith.cmpi sle, %17, %105 : vector<16x16xi32>
      %c10_i32_31 = arith.constant 10 : i32
      %107 = tpu.dynamic_rotate %29 by %c10_i32_31 dim 1 : vector<16x16xf32>, i32 -> vector<16x16xf32>
      %108 = vector.broadcast %cst_3 : f32 to vector<16x16xf32>
      %109 = arith.select %106, %107, %108 : vector<16x16xi1>, vector<16x16xf32>
      %110 = arith.minimumf %104, %109 : vector<16x16xf32>
      %cst_32 = arith.constant 3.600000e+01 : f32
      %111 = vector.broadcast %cst_32 : f32 to vector<16x16xf32>
      %112 = arith.addf %110, %111 : vector<16x16xf32>
      %113 = arith.minimumf %99, %112 : vector<16x16xf32>
      %c7_i32 = arith.constant 7 : i32
      %114 = vector.broadcast %c7_i32 : i32 to vector<16x16xi32>
      %115 = arith.cmpi sge, %17, %114 : vector<16x16xi32>
      %c7_i32_33 = arith.constant 7 : i32
      %116 = tpu.dynamic_rotate %29 by %c7_i32_33 dim 1 : vector<16x16xf32>, i32 -> vector<16x16xf32>
      %117 = vector.broadcast %cst_3 : f32 to vector<16x16xf32>
      %118 = arith.select %115, %116, %117 : vector<16x16xi1>, vector<16x16xf32>
      %c8_i32 = arith.constant 8 : i32
      %119 = vector.broadcast %c8_i32 : i32 to vector<16x16xi32>
      %120 = arith.cmpi sle, %17, %119 : vector<16x16xi32>
      %c9_i32_34 = arith.constant 9 : i32
      %121 = tpu.dynamic_rotate %29 by %c9_i32_34 dim 1 : vector<16x16xf32>, i32 -> vector<16x16xf32>
      %122 = vector.broadcast %cst_3 : f32 to vector<16x16xf32>
      %123 = arith.select %120, %121, %122 : vector<16x16xi1>, vector<16x16xf32>
      %124 = arith.minimumf %118, %123 : vector<16x16xf32>
      %cst_35 = arith.constant 4.900000e+01 : f32
      %125 = vector.broadcast %cst_35 : f32 to vector<16x16xf32>
      %126 = arith.addf %124, %125 : vector<16x16xf32>
      %127 = arith.minimumf %113, %126 : vector<16x16xf32>
      %c8_i32_36 = arith.constant 8 : i32
      %128 = vector.broadcast %c8_i32_36 : i32 to vector<16x16xi32>
      %129 = arith.cmpi sge, %17, %128 : vector<16x16xi32>
      %c8_i32_37 = arith.constant 8 : i32
      %130 = tpu.dynamic_rotate %29 by %c8_i32_37 dim 1 : vector<16x16xf32>, i32 -> vector<16x16xf32>
      %131 = vector.broadcast %cst_3 : f32 to vector<16x16xf32>
      %132 = arith.select %129, %130, %131 : vector<16x16xi1>, vector<16x16xf32>
      %c7_i32_38 = arith.constant 7 : i32
      %133 = vector.broadcast %c7_i32_38 : i32 to vector<16x16xi32>
      %134 = arith.cmpi sle, %17, %133 : vector<16x16xi32>
      %c8_i32_39 = arith.constant 8 : i32
      %135 = tpu.dynamic_rotate %29 by %c8_i32_39 dim 1 : vector<16x16xf32>, i32 -> vector<16x16xf32>
      %136 = vector.broadcast %cst_3 : f32 to vector<16x16xf32>
      %137 = arith.select %134, %135, %136 : vector<16x16xi1>, vector<16x16xf32>
      %138 = arith.minimumf %132, %137 : vector<16x16xf32>
      %cst_40 = arith.constant 6.400000e+01 : f32
      %139 = vector.broadcast %cst_40 : f32 to vector<16x16xf32>
      %140 = arith.addf %138, %139 : vector<16x16xf32>
      %141 = arith.minimumf %127, %140 : vector<16x16xf32>
      %c9_i32_41 = arith.constant 9 : i32
      %142 = vector.broadcast %c9_i32_41 : i32 to vector<16x16xi32>
      %143 = arith.cmpi sge, %17, %142 : vector<16x16xi32>
      %c9_i32_42 = arith.constant 9 : i32
      %144 = tpu.dynamic_rotate %29 by %c9_i32_42 dim 1 : vector<16x16xf32>, i32 -> vector<16x16xf32>
      %145 = vector.broadcast %cst_3 : f32 to vector<16x16xf32>
      %146 = arith.select %143, %144, %145 : vector<16x16xi1>, vector<16x16xf32>
      %c6_i32_43 = arith.constant 6 : i32
      %147 = vector.broadcast %c6_i32_43 : i32 to vector<16x16xi32>
      %148 = arith.cmpi sle, %17, %147 : vector<16x16xi32>
      %c7_i32_44 = arith.constant 7 : i32
      %149 = tpu.dynamic_rotate %29 by %c7_i32_44 dim 1 : vector<16x16xf32>, i32 -> vector<16x16xf32>
      %150 = vector.broadcast %cst_3 : f32 to vector<16x16xf32>
      %151 = arith.select %148, %149, %150 : vector<16x16xi1>, vector<16x16xf32>
      %152 = arith.minimumf %146, %151 : vector<16x16xf32>
      %cst_45 = arith.constant 8.100000e+01 : f32
      %153 = vector.broadcast %cst_45 : f32 to vector<16x16xf32>
      %154 = arith.addf %152, %153 : vector<16x16xf32>
      %155 = arith.minimumf %141, %154 : vector<16x16xf32>
      %c10_i32_46 = arith.constant 10 : i32
      %156 = vector.broadcast %c10_i32_46 : i32 to vector<16x16xi32>
      %157 = arith.cmpi sge, %17, %156 : vector<16x16xi32>
      %c10_i32_47 = arith.constant 10 : i32
      %158 = tpu.dynamic_rotate %29 by %c10_i32_47 dim 1 : vector<16x16xf32>, i32 -> vector<16x16xf32>
      %159 = vector.broadcast %cst_3 : f32 to vector<16x16xf32>
      %160 = arith.select %157, %158, %159 : vector<16x16xi1>, vector<16x16xf32>
      %c5_i32_48 = arith.constant 5 : i32
      %161 = vector.broadcast %c5_i32_48 : i32 to vector<16x16xi32>
      %162 = arith.cmpi sle, %17, %161 : vector<16x16xi32>
      %c6_i32_49 = arith.constant 6 : i32
      %163 = tpu.dynamic_rotate %29 by %c6_i32_49 dim 1 : vector<16x16xf32>, i32 -> vector<16x16xf32>
      %164 = vector.broadcast %cst_3 : f32 to vector<16x16xf32>
      %165 = arith.select %162, %163, %164 : vector<16x16xi1>, vector<16x16xf32>
      %166 = arith.minimumf %160, %165 : vector<16x16xf32>
      %cst_50 = arith.constant 1.000000e+02 : f32
      %167 = vector.broadcast %cst_50 : f32 to vector<16x16xf32>
      %168 = arith.addf %166, %167 : vector<16x16xf32>
      %169 = arith.minimumf %155, %168 : vector<16x16xf32>
      %c11_i32_51 = arith.constant 11 : i32
      %170 = vector.broadcast %c11_i32_51 : i32 to vector<16x16xi32>
      %171 = arith.cmpi sge, %17, %170 : vector<16x16xi32>
      %c11_i32_52 = arith.constant 11 : i32
      %172 = tpu.dynamic_rotate %29 by %c11_i32_52 dim 1 : vector<16x16xf32>, i32 -> vector<16x16xf32>
      %173 = vector.broadcast %cst_3 : f32 to vector<16x16xf32>
      %174 = arith.select %171, %172, %173 : vector<16x16xi1>, vector<16x16xf32>
      %c4_i32_53 = arith.constant 4 : i32
      %175 = vector.broadcast %c4_i32_53 : i32 to vector<16x16xi32>
      %176 = arith.cmpi sle, %17, %175 : vector<16x16xi32>
      %c5_i32_54 = arith.constant 5 : i32
      %177 = tpu.dynamic_rotate %29 by %c5_i32_54 dim 1 : vector<16x16xf32>, i32 -> vector<16x16xf32>
      %178 = vector.broadcast %cst_3 : f32 to vector<16x16xf32>
      %179 = arith.select %176, %177, %178 : vector<16x16xi1>, vector<16x16xf32>
      %180 = arith.minimumf %174, %179 : vector<16x16xf32>
      %cst_55 = arith.constant 1.210000e+02 : f32
      %181 = vector.broadcast %cst_55 : f32 to vector<16x16xf32>
      %182 = arith.addf %180, %181 : vector<16x16xf32>
      %183 = arith.minimumf %169, %182 : vector<16x16xf32>
      %c12_i32_56 = arith.constant 12 : i32
      %184 = vector.broadcast %c12_i32_56 : i32 to vector<16x16xi32>
      %185 = arith.cmpi sge, %17, %184 : vector<16x16xi32>
      %c12_i32_57 = arith.constant 12 : i32
      %186 = tpu.dynamic_rotate %29 by %c12_i32_57 dim 1 : vector<16x16xf32>, i32 -> vector<16x16xf32>
      %187 = vector.broadcast %cst_3 : f32 to vector<16x16xf32>
      %188 = arith.select %185, %186, %187 : vector<16x16xi1>, vector<16x16xf32>
      %c3_i32_58 = arith.constant 3 : i32
      %189 = vector.broadcast %c3_i32_58 : i32 to vector<16x16xi32>
      %190 = arith.cmpi sle, %17, %189 : vector<16x16xi32>
      %c4_i32_59 = arith.constant 4 : i32
      %191 = tpu.dynamic_rotate %29 by %c4_i32_59 dim 1 : vector<16x16xf32>, i32 -> vector<16x16xf32>
      %192 = vector.broadcast %cst_3 : f32 to vector<16x16xf32>
      %193 = arith.select %190, %191, %192 : vector<16x16xi1>, vector<16x16xf32>
      %194 = arith.minimumf %188, %193 : vector<16x16xf32>
      %cst_60 = arith.constant 1.440000e+02 : f32
      %195 = vector.broadcast %cst_60 : f32 to vector<16x16xf32>
      %196 = arith.addf %194, %195 : vector<16x16xf32>
      %197 = arith.minimumf %183, %196 : vector<16x16xf32>
      %c13_i32_61 = arith.constant 13 : i32
      %198 = vector.broadcast %c13_i32_61 : i32 to vector<16x16xi32>
      %199 = arith.cmpi sge, %17, %198 : vector<16x16xi32>
      %c13_i32_62 = arith.constant 13 : i32
      %200 = tpu.dynamic_rotate %29 by %c13_i32_62 dim 1 : vector<16x16xf32>, i32 -> vector<16x16xf32>
      %201 = vector.broadcast %cst_3 : f32 to vector<16x16xf32>
      %202 = arith.select %199, %200, %201 : vector<16x16xi1>, vector<16x16xf32>
      %c2_i32_63 = arith.constant 2 : i32
      %203 = vector.broadcast %c2_i32_63 : i32 to vector<16x16xi32>
      %204 = arith.cmpi sle, %17, %203 : vector<16x16xi32>
      %c3_i32_64 = arith.constant 3 : i32
      %205 = tpu.dynamic_rotate %29 by %c3_i32_64 dim 1 : vector<16x16xf32>, i32 -> vector<16x16xf32>
      %206 = vector.broadcast %cst_3 : f32 to vector<16x16xf32>
      %207 = arith.select %204, %205, %206 : vector<16x16xi1>, vector<16x16xf32>
      %208 = arith.minimumf %202, %207 : vector<16x16xf32>
      %cst_65 = arith.constant 1.690000e+02 : f32
      %209 = vector.broadcast %cst_65 : f32 to vector<16x16xf32>
      %210 = arith.addf %208, %209 : vector<16x16xf32>
      %211 = arith.minimumf %197, %210 : vector<16x16xf32>
      %c14_i32_66 = arith.constant 14 : i32
      %212 = vector.broadcast %c14_i32_66 : i32 to vector<16x16xi32>
      %213 = arith.cmpi sge, %17, %212 : vector<16x16xi32>
      %c14_i32_67 = arith.constant 14 : i32
      %214 = tpu.dynamic_rotate %29 by %c14_i32_67 dim 1 : vector<16x16xf32>, i32 -> vector<16x16xf32>
      %215 = vector.broadcast %cst_3 : f32 to vector<16x16xf32>
      %216 = arith.select %213, %214, %215 : vector<16x16xi1>, vector<16x16xf32>
      %c1_i32_68 = arith.constant 1 : i32
      %217 = vector.broadcast %c1_i32_68 : i32 to vector<16x16xi32>
      %218 = arith.cmpi sle, %17, %217 : vector<16x16xi32>
      %c2_i32_69 = arith.constant 2 : i32
      %219 = tpu.dynamic_rotate %29 by %c2_i32_69 dim 1 : vector<16x16xf32>, i32 -> vector<16x16xf32>
      %220 = vector.broadcast %cst_3 : f32 to vector<16x16xf32>
      %221 = arith.select %218, %219, %220 : vector<16x16xi1>, vector<16x16xf32>
      %222 = arith.minimumf %216, %221 : vector<16x16xf32>
      %cst_70 = arith.constant 1.960000e+02 : f32
      %223 = vector.broadcast %cst_70 : f32 to vector<16x16xf32>
      %224 = arith.addf %222, %223 : vector<16x16xf32>
      %225 = arith.minimumf %211, %224 : vector<16x16xf32>
      %c15_i32_71 = arith.constant 15 : i32
      %226 = vector.broadcast %c15_i32_71 : i32 to vector<16x16xi32>
      %227 = arith.cmpi sge, %17, %226 : vector<16x16xi32>
      %c15_i32_72 = arith.constant 15 : i32
      %228 = tpu.dynamic_rotate %29 by %c15_i32_72 dim 1 : vector<16x16xf32>, i32 -> vector<16x16xf32>
      %229 = vector.broadcast %cst_3 : f32 to vector<16x16xf32>
      %230 = arith.select %227, %228, %229 : vector<16x16xi1>, vector<16x16xf32>
      %c0_i32_73 = arith.constant 0 : i32
      %231 = vector.broadcast %c0_i32_73 : i32 to vector<16x16xi32>
      %232 = arith.cmpi sle, %17, %231 : vector<16x16xi32>
      %c1_i32_74 = arith.constant 1 : i32
      %233 = tpu.dynamic_rotate %29 by %c1_i32_74 dim 1 : vector<16x16xf32>, i32 -> vector<16x16xf32>
      %234 = vector.broadcast %cst_3 : f32 to vector<16x16xf32>
      %235 = arith.select %232, %233, %234 : vector<16x16xi1>, vector<16x16xf32>
      %236 = arith.minimumf %230, %235 : vector<16x16xf32>
      %cst_75 = arith.constant 2.250000e+02 : f32
      %237 = vector.broadcast %cst_75 : f32 to vector<16x16xf32>
      %238 = arith.addf %236, %237 : vector<16x16xf32>
      %239 = arith.minimumf %225, %238 : vector<16x16xf32>
      %c0_76 = arith.constant 0 : index
      %c0_77 = arith.constant 0 : index
      %240 = vector.load %arg6[%c0_76, %c0_77] : memref<16x16xf32, #tpu.memory_space<vmem>>, vector<16x16xf32>
      tpu.vector_store %arg6[%c0_76, %c0_77], %239 {strides = array<i32>} : memref<16x16xf32, #tpu.memory_space<vmem>>, vector<16x16xf32>,
      %241 = vector.broadcast %cst_3 : f32 to vector<16x16xf32>
      %c0_i32_78 = arith.constant 0 : i32
      %242 = arith.sitofp %c0_i32_78 : i32 to f32
      %243 = vector.broadcast %242 : f32 to vector<16x16xf32>
      %244 = arith.subf %18, %243 : vector<16x16xf32>
      %245 = arith.mulf %244, %244 : vector<16x16xf32>
      %246 = arith.index_cast %c0_i32_78 : i32 to index
      %c0_79 = arith.constant 0 : index
      %247 = vector.load %arg6[%246, %c0_79] : memref<16x16xf32, #tpu.memory_space<vmem>>, vector<1x16xf32>
      %248 = vector.broadcast %247 : vector<1x16xf32> to vector<16x16xf32>
      %249 = arith.addf %245, %248 : vector<16x16xf32>
      %250 = arith.minimumf %241, %249 : vector<16x16xf32>
      %c1_i32_80 = arith.constant 1 : i32
      %251 = arith.sitofp %c1_i32_80 : i32 to f32
      %252 = vector.broadcast %251 : f32 to vector<16x16xf32>
      %253 = arith.subf %18, %252 : vector<16x16xf32>
      %254 = arith.mulf %253, %253 : vector<16x16xf32>
      %255 = arith.index_cast %c1_i32_80 : i32 to index
      %c0_81 = arith.constant 0 : index
      %256 = vector.load %arg6[%255, %c0_81] : memref<16x16xf32, #tpu.memory_space<vmem>>, vector<1x16xf32>
      %257 = vector.broadcast %256 : vector<1x16xf32> to vector<16x16xf32>
      %258 = arith.addf %254, %257 : vector<16x16xf32>
      %259 = arith.minimumf %250, %258 : vector<16x16xf32>
      %c2_i32_82 = arith.constant 2 : i32
      %260 = arith.sitofp %c2_i32_82 : i32 to f32
      %261 = vector.broadcast %260 : f32 to vector<16x16xf32>
      %262 = arith.subf %18, %261 : vector<16x16xf32>
      %263 = arith.mulf %262, %262 : vector<16x16xf32>
      %264 = arith.index_cast %c2_i32_82 : i32 to index
      %c0_83 = arith.constant 0 : index
      %265 = vector.load %arg6[%264, %c0_83] : memref<16x16xf32, #tpu.memory_space<vmem>>, vector<1x16xf32>
      %266 = vector.broadcast %265 : vector<1x16xf32> to vector<16x16xf32>
      %267 = arith.addf %263, %266 : vector<16x16xf32>
      %268 = arith.minimumf %259, %267 : vector<16x16xf32>
      %c3_i32_84 = arith.constant 3 : i32
      %269 = arith.sitofp %c3_i32_84 : i32 to f32
      %270 = vector.broadcast %269 : f32 to vector<16x16xf32>
      %271 = arith.subf %18, %270 : vector<16x16xf32>
      %272 = arith.mulf %271, %271 : vector<16x16xf32>
      %273 = arith.index_cast %c3_i32_84 : i32 to index
      %c0_85 = arith.constant 0 : index
      %274 = vector.load %arg6[%273, %c0_85] : memref<16x16xf32, #tpu.memory_space<vmem>>, vector<1x16xf32>
      %275 = vector.broadcast %274 : vector<1x16xf32> to vector<16x16xf32>
      %276 = arith.addf %272, %275 : vector<16x16xf32>
      %277 = arith.minimumf %268, %276 : vector<16x16xf32>
      %c4_i32_86 = arith.constant 4 : i32
      %278 = arith.sitofp %c4_i32_86 : i32 to f32
      %279 = vector.broadcast %278 : f32 to vector<16x16xf32>
      %280 = arith.subf %18, %279 : vector<16x16xf32>
      %281 = arith.mulf %280, %280 : vector<16x16xf32>
      %282 = arith.index_cast %c4_i32_86 : i32 to index
      %c0_87 = arith.constant 0 : index
      %283 = vector.load %arg6[%282, %c0_87] : memref<16x16xf32, #tpu.memory_space<vmem>>, vector<1x16xf32>
      %284 = vector.broadcast %283 : vector<1x16xf32> to vector<16x16xf32>
      %285 = arith.addf %281, %284 : vector<16x16xf32>
      %286 = arith.minimumf %277, %285 : vector<16x16xf32>
      %c5_i32_88 = arith.constant 5 : i32
      %287 = arith.sitofp %c5_i32_88 : i32 to f32
      %288 = vector.broadcast %287 : f32 to vector<16x16xf32>
      %289 = arith.subf %18, %288 : vector<16x16xf32>
      %290 = arith.mulf %289, %289 : vector<16x16xf32>
      %291 = arith.index_cast %c5_i32_88 : i32 to index
      %c0_89 = arith.constant 0 : index
      %292 = vector.load %arg6[%291, %c0_89] : memref<16x16xf32, #tpu.memory_space<vmem>>, vector<1x16xf32>
      %293 = vector.broadcast %292 : vector<1x16xf32> to vector<16x16xf32>
      %294 = arith.addf %290, %293 : vector<16x16xf32>
      %295 = arith.minimumf %286, %294 : vector<16x16xf32>
      %c6_i32_90 = arith.constant 6 : i32
      %296 = arith.sitofp %c6_i32_90 : i32 to f32
      %297 = vector.broadcast %296 : f32 to vector<16x16xf32>
      %298 = arith.subf %18, %297 : vector<16x16xf32>
      %299 = arith.mulf %298, %298 : vector<16x16xf32>
      %300 = arith.index_cast %c6_i32_90 : i32 to index
      %c0_91 = arith.constant 0 : index
      %301 = vector.load %arg6[%300, %c0_91] : memref<16x16xf32, #tpu.memory_space<vmem>>, vector<1x16xf32>
      %302 = vector.broadcast %301 : vector<1x16xf32> to vector<16x16xf32>
      %303 = arith.addf %299, %302 : vector<16x16xf32>
      %304 = arith.minimumf %295, %303 : vector<16x16xf32>
      %c7_i32_92 = arith.constant 7 : i32
      %305 = arith.sitofp %c7_i32_92 : i32 to f32
      %306 = vector.broadcast %305 : f32 to vector<16x16xf32>
      %307 = arith.subf %18, %306 : vector<16x16xf32>
      %308 = arith.mulf %307, %307 : vector<16x16xf32>
      %309 = arith.index_cast %c7_i32_92 : i32 to index
      %c0_93 = arith.constant 0 : index
      %310 = vector.load %arg6[%309, %c0_93] : memref<16x16xf32, #tpu.memory_space<vmem>>, vector<1x16xf32>
      %311 = vector.broadcast %310 : vector<1x16xf32> to vector<16x16xf32>
      %312 = arith.addf %308, %311 : vector<16x16xf32>
      %313 = arith.minimumf %304, %312 : vector<16x16xf32>
      %c8_i32_94 = arith.constant 8 : i32
      %314 = arith.sitofp %c8_i32_94 : i32 to f32
      %315 = vector.broadcast %314 : f32 to vector<16x16xf32>
      %316 = arith.subf %18, %315 : vector<16x16xf32>
      %317 = arith.mulf %316, %316 : vector<16x16xf32>
      %318 = arith.index_cast %c8_i32_94 : i32 to index
      %c0_95 = arith.constant 0 : index
      %319 = vector.load %arg6[%318, %c0_95] : memref<16x16xf32, #tpu.memory_space<vmem>>, vector<1x16xf32>
      %320 = vector.broadcast %319 : vector<1x16xf32> to vector<16x16xf32>
      %321 = arith.addf %317, %320 : vector<16x16xf32>
      %322 = arith.minimumf %313, %321 : vector<16x16xf32>
      %c9_i32_96 = arith.constant 9 : i32
      %323 = arith.sitofp %c9_i32_96 : i32 to f32
      %324 = vector.broadcast %323 : f32 to vector<16x16xf32>
      %325 = arith.subf %18, %324 : vector<16x16xf32>
      %326 = arith.mulf %325, %325 : vector<16x16xf32>
      %327 = arith.index_cast %c9_i32_96 : i32 to index
      %c0_97 = arith.constant 0 : index
      %328 = vector.load %arg6[%327, %c0_97] : memref<16x16xf32, #tpu.memory_space<vmem>>, vector<1x16xf32>
      %329 = vector.broadcast %328 : vector<1x16xf32> to vector<16x16xf32>
      %330 = arith.addf %326, %329 : vector<16x16xf32>
      %331 = arith.minimumf %322, %330 : vector<16x16xf32>
      %c10_i32_98 = arith.constant 10 : i32
      %332 = arith.sitofp %c10_i32_98 : i32 to f32
      %333 = vector.broadcast %332 : f32 to vector<16x16xf32>
      %334 = arith.subf %18, %333 : vector<16x16xf32>
      %335 = arith.mulf %334, %334 : vector<16x16xf32>
      %336 = arith.index_cast %c10_i32_98 : i32 to index
      %c0_99 = arith.constant 0 : index
      %337 = vector.load %arg6[%336, %c0_99] : memref<16x16xf32, #tpu.memory_space<vmem>>, vector<1x16xf32>
      %338 = vector.broadcast %337 : vector<1x16xf32> to vector<16x16xf32>
      %339 = arith.addf %335, %338 : vector<16x16xf32>
      %340 = arith.minimumf %331, %339 : vector<16x16xf32>
      %c11_i32_100 = arith.constant 11 : i32
      %341 = arith.sitofp %c11_i32_100 : i32 to f32
      %342 = vector.broadcast %341 : f32 to vector<16x16xf32>
      %343 = arith.subf %18, %342 : vector<16x16xf32>
      %344 = arith.mulf %343, %343 : vector<16x16xf32>
      %345 = arith.index_cast %c11_i32_100 : i32 to index
      %c0_101 = arith.constant 0 : index
      %346 = vector.load %arg6[%345, %c0_101] : memref<16x16xf32, #tpu.memory_space<vmem>>, vector<1x16xf32>
      %347 = vector.broadcast %346 : vector<1x16xf32> to vector<16x16xf32>
      %348 = arith.addf %344, %347 : vector<16x16xf32>
      %349 = arith.minimumf %340, %348 : vector<16x16xf32>
      %c12_i32_102 = arith.constant 12 : i32
      %350 = arith.sitofp %c12_i32_102 : i32 to f32
      %351 = vector.broadcast %350 : f32 to vector<16x16xf32>
      %352 = arith.subf %18, %351 : vector<16x16xf32>
      %353 = arith.mulf %352, %352 : vector<16x16xf32>
      %354 = arith.index_cast %c12_i32_102 : i32 to index
      %c0_103 = arith.constant 0 : index
      %355 = vector.load %arg6[%354, %c0_103] : memref<16x16xf32, #tpu.memory_space<vmem>>, vector<1x16xf32>
      %356 = vector.broadcast %355 : vector<1x16xf32> to vector<16x16xf32>
      %357 = arith.addf %353, %356 : vector<16x16xf32>
      %358 = arith.minimumf %349, %357 : vector<16x16xf32>
      %c13_i32_104 = arith.constant 13 : i32
      %359 = arith.sitofp %c13_i32_104 : i32 to f32
      %360 = vector.broadcast %359 : f32 to vector<16x16xf32>
      %361 = arith.subf %18, %360 : vector<16x16xf32>
      %362 = arith.mulf %361, %361 : vector<16x16xf32>
      %363 = arith.index_cast %c13_i32_104 : i32 to index
      %c0_105 = arith.constant 0 : index
      %364 = vector.load %arg6[%363, %c0_105] : memref<16x16xf32, #tpu.memory_space<vmem>>, vector<1x16xf32>
      %365 = vector.broadcast %364 : vector<1x16xf32> to vector<16x16xf32>
      %366 = arith.addf %362, %365 : vector<16x16xf32>
      %367 = arith.minimumf %358, %366 : vector<16x16xf32>
      %c14_i32_106 = arith.constant 14 : i32
      %368 = arith.sitofp %c14_i32_106 : i32 to f32
      %369 = vector.broadcast %368 : f32 to vector<16x16xf32>
      %370 = arith.subf %18, %369 : vector<16x16xf32>
      %371 = arith.mulf %370, %370 : vector<16x16xf32>
      %372 = arith.index_cast %c14_i32_106 : i32 to index
      %c0_107 = arith.constant 0 : index
      %373 = vector.load %arg6[%372, %c0_107] : memref<16x16xf32, #tpu.memory_space<vmem>>, vector<1x16xf32>
      %374 = vector.broadcast %373 : vector<1x16xf32> to vector<16x16xf32>
      %375 = arith.addf %371, %374 : vector<16x16xf32>
      %376 = arith.minimumf %367, %375 : vector<16x16xf32>
      %c15_i32_108 = arith.constant 15 : i32
      %377 = arith.sitofp %c15_i32_108 : i32 to f32
      %378 = vector.broadcast %377 : f32 to vector<16x16xf32>
      %379 = arith.subf %18, %378 : vector<16x16xf32>
      %380 = arith.mulf %379, %379 : vector<16x16xf32>
      %381 = arith.index_cast %c15_i32_108 : i32 to index
      %c0_109 = arith.constant 0 : index
      %382 = vector.load %arg6[%381, %c0_109] : memref<16x16xf32, #tpu.memory_space<vmem>>, vector<1x16xf32>
      %383 = vector.broadcast %382 : vector<1x16xf32> to vector<16x16xf32>
      %384 = arith.addf %380, %383 : vector<16x16xf32>
      %385 = arith.minimumf %376, %384 : vector<16x16xf32>
      %c16_i32 = arith.constant 16 : i32
      %386 = math.sqrt %385 : vector<16x16xf32>
      %cst_110 = arith.constant 1.000000e+00 : f32
      %387 = vector.broadcast %cst_110 : f32 to vector<16x16xf32>
      %388 = arith.subf %387, %23 : vector<16x16xf32>
      %389 = vector.broadcast %cst_3 : f32 to vector<16x16xf32>
      %390 = arith.mulf %388, %389 : vector<16x16xf32>
      %c1_i32_111 = arith.constant 1 : i32
      %391 = vector.broadcast %c1_i32_111 : i32 to vector<16x16xi32>
      %392 = arith.cmpi sge, %17, %391 : vector<16x16xi32>
      %c1_i32_112 = arith.constant 1 : i32
      %393 = tpu.dynamic_rotate %390 by %c1_i32_112 dim 1 : vector<16x16xf32>, i32 -> vector<16x16xf32>
      %394 = vector.broadcast %cst_3 : f32 to vector<16x16xf32>
      %395 = arith.select %392, %393, %394 : vector<16x16xi1>, vector<16x16xf32>
      %c14_i32_113 = arith.constant 14 : i32
      %396 = vector.broadcast %c14_i32_113 : i32 to vector<16x16xi32>
      %397 = arith.cmpi sle, %17, %396 : vector<16x16xi32>
      %c15_i32_114 = arith.constant 15 : i32
      %398 = tpu.dynamic_rotate %390 by %c15_i32_114 dim 1 : vector<16x16xf32>, i32 -> vector<16x16xf32>
      %399 = vector.broadcast %cst_3 : f32 to vector<16x16xf32>
      %400 = arith.select %397, %398, %399 : vector<16x16xi1>, vector<16x16xf32>
      %401 = arith.minimumf %395, %400 : vector<16x16xf32>
      %cst_115 = arith.constant 1.000000e+00 : f32
      %402 = vector.broadcast %cst_115 : f32 to vector<16x16xf32>
      %403 = arith.addf %401, %402 : vector<16x16xf32>
      %404 = arith.minimumf %390, %403 : vector<16x16xf32>
      %c2_i32_116 = arith.constant 2 : i32
      %405 = vector.broadcast %c2_i32_116 : i32 to vector<16x16xi32>
      %406 = arith.cmpi sge, %17, %405 : vector<16x16xi32>
      %c2_i32_117 = arith.constant 2 : i32
      %407 = tpu.dynamic_rotate %390 by %c2_i32_117 dim 1 : vector<16x16xf32>, i32 -> vector<16x16xf32>
      %408 = vector.broadcast %cst_3 : f32 to vector<16x16xf32>
      %409 = arith.select %406, %407, %408 : vector<16x16xi1>, vector<16x16xf32>
      %c13_i32_118 = arith.constant 13 : i32
      %410 = vector.broadcast %c13_i32_118 : i32 to vector<16x16xi32>
      %411 = arith.cmpi sle, %17, %410 : vector<16x16xi32>
      %c14_i32_119 = arith.constant 14 : i32
      %412 = tpu.dynamic_rotate %390 by %c14_i32_119 dim 1 : vector<16x16xf32>, i32 -> vector<16x16xf32>
      %413 = vector.broadcast %cst_3 : f32 to vector<16x16xf32>
      %414 = arith.select %411, %412, %413 : vector<16x16xi1>, vector<16x16xf32>
      %415 = arith.minimumf %409, %414 : vector<16x16xf32>
      %cst_120 = arith.constant 4.000000e+00 : f32
      %416 = vector.broadcast %cst_120 : f32 to vector<16x16xf32>
      %417 = arith.addf %415, %416 : vector<16x16xf32>
      %418 = arith.minimumf %404, %417 : vector<16x16xf32>
      %c3_i32_121 = arith.constant 3 : i32
      %419 = vector.broadcast %c3_i32_121 : i32 to vector<16x16xi32>
      %420 = arith.cmpi sge, %17, %419 : vector<16x16xi32>
      %c3_i32_122 = arith.constant 3 : i32
      %421 = tpu.dynamic_rotate %390 by %c3_i32_122 dim 1 : vector<16x16xf32>, i32 -> vector<16x16xf32>
      %422 = vector.broadcast %cst_3 : f32 to vector<16x16xf32>
      %423 = arith.select %420, %421, %422 : vector<16x16xi1>, vector<16x16xf32>
      %c12_i32_123 = arith.constant 12 : i32
      %424 = vector.broadcast %c12_i32_123 : i32 to vector<16x16xi32>
      %425 = arith.cmpi sle, %17, %424 : vector<16x16xi32>
      %c13_i32_124 = arith.constant 13 : i32
      %426 = tpu.dynamic_rotate %390 by %c13_i32_124 dim 1 : vector<16x16xf32>, i32 -> vector<16x16xf32>
      %427 = vector.broadcast %cst_3 : f32 to vector<16x16xf32>
      %428 = arith.select %425, %426, %427 : vector<16x16xi1>, vector<16x16xf32>
      %429 = arith.minimumf %423, %428 : vector<16x16xf32>
      %cst_125 = arith.constant 9.000000e+00 : f32
      %430 = vector.broadcast %cst_125 : f32 to vector<16x16xf32>
      %431 = arith.addf %429, %430 : vector<16x16xf32>
      %432 = arith.minimumf %418, %431 : vector<16x16xf32>
      %c4_i32_126 = arith.constant 4 : i32
      %433 = vector.broadcast %c4_i32_126 : i32 to vector<16x16xi32>
      %434 = arith.cmpi sge, %17, %433 : vector<16x16xi32>
      %c4_i32_127 = arith.constant 4 : i32
      %435 = tpu.dynamic_rotate %390 by %c4_i32_127 dim 1 : vector<16x16xf32>, i32 -> vector<16x16xf32>
      %436 = vector.broadcast %cst_3 : f32 to vector<16x16xf32>
      %437 = arith.select %434, %435, %436 : vector<16x16xi1>, vector<16x16xf32>
      %c11_i32_128 = arith.constant 11 : i32
      %438 = vector.broadcast %c11_i32_128 : i32 to vector<16x16xi32>
      %439 = arith.cmpi sle, %17, %438 : vector<16x16xi32>
      %c12_i32_129 = arith.constant 12 : i32
      %440 = tpu.dynamic_rotate %390 by %c12_i32_129 dim 1 : vector<16x16xf32>, i32 -> vector<16x16xf32>
      %441 = vector.broadcast %cst_3 : f32 to vector<16x16xf32>
      %442 = arith.select %439, %440, %441 : vector<16x16xi1>, vector<16x16xf32>
      %443 = arith.minimumf %437, %442 : vector<16x16xf32>
      %cst_130 = arith.constant 1.600000e+01 : f32
      %444 = vector.broadcast %cst_130 : f32 to vector<16x16xf32>
      %445 = arith.addf %443, %444 : vector<16x16xf32>
      %446 = arith.minimumf %432, %445 : vector<16x16xf32>
      %c5_i32_131 = arith.constant 5 : i32
      %447 = vector.broadcast %c5_i32_131 : i32 to vector<16x16xi32>
      %448 = arith.cmpi sge, %17, %447 : vector<16x16xi32>
      %c5_i32_132 = arith.constant 5 : i32
      %449 = tpu.dynamic_rotate %390 by %c5_i32_132 dim 1 : vector<16x16xf32>, i32 -> vector<16x16xf32>
      %450 = vector.broadcast %cst_3 : f32 to vector<16x16xf32>
      %451 = arith.select %448, %449, %450 : vector<16x16xi1>, vector<16x16xf32>
      %c10_i32_133 = arith.constant 10 : i32
      %452 = vector.broadcast %c10_i32_133 : i32 to vector<16x16xi32>
      %453 = arith.cmpi sle, %17, %452 : vector<16x16xi32>
      %c11_i32_134 = arith.constant 11 : i32
      %454 = tpu.dynamic_rotate %390 by %c11_i32_134 dim 1 : vector<16x16xf32>, i32 -> vector<16x16xf32>
      %455 = vector.broadcast %cst_3 : f32 to vector<16x16xf32>
      %456 = arith.select %453, %454, %455 : vector<16x16xi1>, vector<16x16xf32>
      %457 = arith.minimumf %451, %456 : vector<16x16xf32>
      %cst_135 = arith.constant 2.500000e+01 : f32
      %458 = vector.broadcast %cst_135 : f32 to vector<16x16xf32>
      %459 = arith.addf %457, %458 : vector<16x16xf32>
      %460 = arith.minimumf %446, %459 : vector<16x16xf32>
      %c6_i32_136 = arith.constant 6 : i32
      %461 = vector.broadcast %c6_i32_136 : i32 to vector<16x16xi32>
      %462 = arith.cmpi sge, %17, %461 : vector<16x16xi32>
      %c6_i32_137 = arith.constant 6 : i32
      %463 = tpu.dynamic_rotate %390 by %c6_i32_137 dim 1 : vector<16x16xf32>, i32 -> vector<16x16xf32>
      %464 = vector.broadcast %cst_3 : f32 to vector<16x16xf32>
      %465 = arith.select %462, %463, %464 : vector<16x16xi1>, vector<16x16xf32>
      %c9_i32_138 = arith.constant 9 : i32
      %466 = vector.broadcast %c9_i32_138 : i32 to vector<16x16xi32>
      %467 = arith.cmpi sle, %17, %466 : vector<16x16xi32>
      %c10_i32_139 = arith.constant 10 : i32
      %468 = tpu.dynamic_rotate %390 by %c10_i32_139 dim 1 : vector<16x16xf32>, i32 -> vector<16x16xf32>
      %469 = vector.broadcast %cst_3 : f32 to vector<16x16xf32>
      %470 = arith.select %467, %468, %469 : vector<16x16xi1>, vector<16x16xf32>
      %471 = arith.minimumf %465, %470 : vector<16x16xf32>
      %cst_140 = arith.constant 3.600000e+01 : f32
      %472 = vector.broadcast %cst_140 : f32 to vector<16x16xf32>
      %473 = arith.addf %471, %472 : vector<16x16xf32>
      %474 = arith.minimumf %460, %473 : vector<16x16xf32>
      %c7_i32_141 = arith.constant 7 : i32
      %475 = vector.broadcast %c7_i32_141 : i32 to vector<16x16xi32>
      %476 = arith.cmpi sge, %17, %475 : vector<16x16xi32>
      %c7_i32_142 = arith.constant 7 : i32
      %477 = tpu.dynamic_rotate %390 by %c7_i32_142 dim 1 : vector<16x16xf32>, i32 -> vector<16x16xf32>
      %478 = vector.broadcast %cst_3 : f32 to vector<16x16xf32>
      %479 = arith.select %476, %477, %478 : vector<16x16xi1>, vector<16x16xf32>
      %c8_i32_143 = arith.constant 8 : i32
      %480 = vector.broadcast %c8_i32_143 : i32 to vector<16x16xi32>
      %481 = arith.cmpi sle, %17, %480 : vector<16x16xi32>
      %c9_i32_144 = arith.constant 9 : i32
      %482 = tpu.dynamic_rotate %390 by %c9_i32_144 dim 1 : vector<16x16xf32>, i32 -> vector<16x16xf32>
      %483 = vector.broadcast %cst_3 : f32 to vector<16x16xf32>
      %484 = arith.select %481, %482, %483 : vector<16x16xi1>, vector<16x16xf32>
      %485 = arith.minimumf %479, %484 : vector<16x16xf32>
      %cst_145 = arith.constant 4.900000e+01 : f32
      %486 = vector.broadcast %cst_145 : f32 to vector<16x16xf32>
      %487 = arith.addf %485, %486 : vector<16x16xf32>
      %488 = arith.minimumf %474, %487 : vector<16x16xf32>
      %c8_i32_146 = arith.constant 8 : i32
      %489 = vector.broadcast %c8_i32_146 : i32 to vector<16x16xi32>
      %490 = arith.cmpi sge, %17, %489 : vector<16x16xi32>
      %c8_i32_147 = arith.constant 8 : i32
      %491 = tpu.dynamic_rotate %390 by %c8_i32_147 dim 1 : vector<16x16xf32>, i32 -> vector<16x16xf32>
      %492 = vector.broadcast %cst_3 : f32 to vector<16x16xf32>
      %493 = arith.select %490, %491, %492 : vector<16x16xi1>, vector<16x16xf32>
      %c7_i32_148 = arith.constant 7 : i32
      %494 = vector.broadcast %c7_i32_148 : i32 to vector<16x16xi32>
      %495 = arith.cmpi sle, %17, %494 : vector<16x16xi32>
      %c8_i32_149 = arith.constant 8 : i32
      %496 = tpu.dynamic_rotate %390 by %c8_i32_149 dim 1 : vector<16x16xf32>, i32 -> vector<16x16xf32>
      %497 = vector.broadcast %cst_3 : f32 to vector<16x16xf32>
      %498 = arith.select %495, %496, %497 : vector<16x16xi1>, vector<16x16xf32>
      %499 = arith.minimumf %493, %498 : vector<16x16xf32>
      %cst_150 = arith.constant 6.400000e+01 : f32
      %500 = vector.broadcast %cst_150 : f32 to vector<16x16xf32>
      %501 = arith.addf %499, %500 : vector<16x16xf32>
      %502 = arith.minimumf %488, %501 : vector<16x16xf32>
      %c9_i32_151 = arith.constant 9 : i32
      %503 = vector.broadcast %c9_i32_151 : i32 to vector<16x16xi32>
      %504 = arith.cmpi sge, %17, %503 : vector<16x16xi32>
      %c9_i32_152 = arith.constant 9 : i32
      %505 = tpu.dynamic_rotate %390 by %c9_i32_152 dim 1 : vector<16x16xf32>, i32 -> vector<16x16xf32>
      %506 = vector.broadcast %cst_3 : f32 to vector<16x16xf32>
      %507 = arith.select %504, %505, %506 : vector<16x16xi1>, vector<16x16xf32>
      %c6_i32_153 = arith.constant 6 : i32
      %508 = vector.broadcast %c6_i32_153 : i32 to vector<16x16xi32>
      %509 = arith.cmpi sle, %17, %508 : vector<16x16xi32>
      %c7_i32_154 = arith.constant 7 : i32
      %510 = tpu.dynamic_rotate %390 by %c7_i32_154 dim 1 : vector<16x16xf32>, i32 -> vector<16x16xf32>
      %511 = vector.broadcast %cst_3 : f32 to vector<16x16xf32>
      %512 = arith.select %509, %510, %511 : vector<16x16xi1>, vector<16x16xf32>
      %513 = arith.minimumf %507, %512 : vector<16x16xf32>
      %cst_155 = arith.constant 8.100000e+01 : f32
      %514 = vector.broadcast %cst_155 : f32 to vector<16x16xf32>
      %515 = arith.addf %513, %514 : vector<16x16xf32>
      %516 = arith.minimumf %502, %515 : vector<16x16xf32>
      %c10_i32_156 = arith.constant 10 : i32
      %517 = vector.broadcast %c10_i32_156 : i32 to vector<16x16xi32>
      %518 = arith.cmpi sge, %17, %517 : vector<16x16xi32>
      %c10_i32_157 = arith.constant 10 : i32
      %519 = tpu.dynamic_rotate %390 by %c10_i32_157 dim 1 : vector<16x16xf32>, i32 -> vector<16x16xf32>
      %520 = vector.broadcast %cst_3 : f32 to vector<16x16xf32>
      %521 = arith.select %518, %519, %520 : vector<16x16xi1>, vector<16x16xf32>
      %c5_i32_158 = arith.constant 5 : i32
      %522 = vector.broadcast %c5_i32_158 : i32 to vector<16x16xi32>
      %523 = arith.cmpi sle, %17, %522 : vector<16x16xi32>
      %c6_i32_159 = arith.constant 6 : i32
      %524 = tpu.dynamic_rotate %390 by %c6_i32_159 dim 1 : vector<16x16xf32>, i32 -> vector<16x16xf32>
      %525 = vector.broadcast %cst_3 : f32 to vector<16x16xf32>
      %526 = arith.select %523, %524, %525 : vector<16x16xi1>, vector<16x16xf32>
      %527 = arith.minimumf %521, %526 : vector<16x16xf32>
      %cst_160 = arith.constant 1.000000e+02 : f32
      %528 = vector.broadcast %cst_160 : f32 to vector<16x16xf32>
      %529 = arith.addf %527, %528 : vector<16x16xf32>
      %530 = arith.minimumf %516, %529 : vector<16x16xf32>
      %c11_i32_161 = arith.constant 11 : i32
      %531 = vector.broadcast %c11_i32_161 : i32 to vector<16x16xi32>
      %532 = arith.cmpi sge, %17, %531 : vector<16x16xi32>
      %c11_i32_162 = arith.constant 11 : i32
      %533 = tpu.dynamic_rotate %390 by %c11_i32_162 dim 1 : vector<16x16xf32>, i32 -> vector<16x16xf32>
      %534 = vector.broadcast %cst_3 : f32 to vector<16x16xf32>
      %535 = arith.select %532, %533, %534 : vector<16x16xi1>, vector<16x16xf32>
      %c4_i32_163 = arith.constant 4 : i32
      %536 = vector.broadcast %c4_i32_163 : i32 to vector<16x16xi32>
      %537 = arith.cmpi sle, %17, %536 : vector<16x16xi32>
      %c5_i32_164 = arith.constant 5 : i32
      %538 = tpu.dynamic_rotate %390 by %c5_i32_164 dim 1 : vector<16x16xf32>, i32 -> vector<16x16xf32>
      %539 = vector.broadcast %cst_3 : f32 to vector<16x16xf32>
      %540 = arith.select %537, %538, %539 : vector<16x16xi1>, vector<16x16xf32>
      %541 = arith.minimumf %535, %540 : vector<16x16xf32>
      %cst_165 = arith.constant 1.210000e+02 : f32
      %542 = vector.broadcast %cst_165 : f32 to vector<16x16xf32>
      %543 = arith.addf %541, %542 : vector<16x16xf32>
      %544 = arith.minimumf %530, %543 : vector<16x16xf32>
      %c12_i32_166 = arith.constant 12 : i32
      %545 = vector.broadcast %c12_i32_166 : i32 to vector<16x16xi32>
      %546 = arith.cmpi sge, %17, %545 : vector<16x16xi32>
      %c12_i32_167 = arith.constant 12 : i32
      %547 = tpu.dynamic_rotate %390 by %c12_i32_167 dim 1 : vector<16x16xf32>, i32 -> vector<16x16xf32>
      %548 = vector.broadcast %cst_3 : f32 to vector<16x16xf32>
      %549 = arith.select %546, %547, %548 : vector<16x16xi1>, vector<16x16xf32>
      %c3_i32_168 = arith.constant 3 : i32
      %550 = vector.broadcast %c3_i32_168 : i32 to vector<16x16xi32>
      %551 = arith.cmpi sle, %17, %550 : vector<16x16xi32>
      %c4_i32_169 = arith.constant 4 : i32
      %552 = tpu.dynamic_rotate %390 by %c4_i32_169 dim 1 : vector<16x16xf32>, i32 -> vector<16x16xf32>
      %553 = vector.broadcast %cst_3 : f32 to vector<16x16xf32>
      %554 = arith.select %551, %552, %553 : vector<16x16xi1>, vector<16x16xf32>
      %555 = arith.minimumf %549, %554 : vector<16x16xf32>
      %cst_170 = arith.constant 1.440000e+02 : f32
      %556 = vector.broadcast %cst_170 : f32 to vector<16x16xf32>
      %557 = arith.addf %555, %556 : vector<16x16xf32>
      %558 = arith.minimumf %544, %557 : vector<16x16xf32>
      %c13_i32_171 = arith.constant 13 : i32
      %559 = vector.broadcast %c13_i32_171 : i32 to vector<16x16xi32>
      %560 = arith.cmpi sge, %17, %559 : vector<16x16xi32>
      %c13_i32_172 = arith.constant 13 : i32
      %561 = tpu.dynamic_rotate %390 by %c13_i32_172 dim 1 : vector<16x16xf32>, i32 -> vector<16x16xf32>
      %562 = vector.broadcast %cst_3 : f32 to vector<16x16xf32>
      %563 = arith.select %560, %561, %562 : vector<16x16xi1>, vector<16x16xf32>
      %c2_i32_173 = arith.constant 2 : i32
      %564 = vector.broadcast %c2_i32_173 : i32 to vector<16x16xi32>
      %565 = arith.cmpi sle, %17, %564 : vector<16x16xi32>
      %c3_i32_174 = arith.constant 3 : i32
      %566 = tpu.dynamic_rotate %390 by %c3_i32_174 dim 1 : vector<16x16xf32>, i32 -> vector<16x16xf32>
      %567 = vector.broadcast %cst_3 : f32 to vector<16x16xf32>
      %568 = arith.select %565, %566, %567 : vector<16x16xi1>, vector<16x16xf32>
      %569 = arith.minimumf %563, %568 : vector<16x16xf32>
      %cst_175 = arith.constant 1.690000e+02 : f32
      %570 = vector.broadcast %cst_175 : f32 to vector<16x16xf32>
      %571 = arith.addf %569, %570 : vector<16x16xf32>
      %572 = arith.minimumf %558, %571 : vector<16x16xf32>
      %c14_i32_176 = arith.constant 14 : i32
      %573 = vector.broadcast %c14_i32_176 : i32 to vector<16x16xi32>
      %574 = arith.cmpi sge, %17, %573 : vector<16x16xi32>
      %c14_i32_177 = arith.constant 14 : i32
      %575 = tpu.dynamic_rotate %390 by %c14_i32_177 dim 1 : vector<16x16xf32>, i32 -> vector<16x16xf32>
      %576 = vector.broadcast %cst_3 : f32 to vector<16x16xf32>
      %577 = arith.select %574, %575, %576 : vector<16x16xi1>, vector<16x16xf32>
      %c1_i32_178 = arith.constant 1 : i32
      %578 = vector.broadcast %c1_i32_178 : i32 to vector<16x16xi32>
      %579 = arith.cmpi sle, %17, %578 : vector<16x16xi32>
      %c2_i32_179 = arith.constant 2 : i32
      %580 = tpu.dynamic_rotate %390 by %c2_i32_179 dim 1 : vector<16x16xf32>, i32 -> vector<16x16xf32>
      %581 = vector.broadcast %cst_3 : f32 to vector<16x16xf32>
      %582 = arith.select %579, %580, %581 : vector<16x16xi1>, vector<16x16xf32>
      %583 = arith.minimumf %577, %582 : vector<16x16xf32>
      %cst_180 = arith.constant 1.960000e+02 : f32
      %584 = vector.broadcast %cst_180 : f32 to vector<16x16xf32>
      %585 = arith.addf %583, %584 : vector<16x16xf32>
      %586 = arith.minimumf %572, %585 : vector<16x16xf32>
      %c15_i32_181 = arith.constant 15 : i32
      %587 = vector.broadcast %c15_i32_181 : i32 to vector<16x16xi32>
      %588 = arith.cmpi sge, %17, %587 : vector<16x16xi32>
      %c15_i32_182 = arith.constant 15 : i32
      %589 = tpu.dynamic_rotate %390 by %c15_i32_182 dim 1 : vector<16x16xf32>, i32 -> vector<16x16xf32>
      %590 = vector.broadcast %cst_3 : f32 to vector<16x16xf32>
      %591 = arith.select %588, %589, %590 : vector<16x16xi1>, vector<16x16xf32>
      %c0_i32_183 = arith.constant 0 : i32
      %592 = vector.broadcast %c0_i32_183 : i32 to vector<16x16xi32>
      %593 = arith.cmpi sle, %17, %592 : vector<16x16xi32>
      %c1_i32_184 = arith.constant 1 : i32
      %594 = tpu.dynamic_rotate %390 by %c1_i32_184 dim 1 : vector<16x16xf32>, i32 -> vector<16x16xf32>
      %595 = vector.broadcast %cst_3 : f32 to vector<16x16xf32>
      %596 = arith.select %593, %594, %595 : vector<16x16xi1>, vector<16x16xf32>
      %597 = arith.minimumf %591, %596 : vector<16x16xf32>
      %cst_185 = arith.constant 2.250000e+02 : f32
      %598 = vector.broadcast %cst_185 : f32 to vector<16x16xf32>
      %599 = arith.addf %597, %598 : vector<16x16xf32>
      %600 = arith.minimumf %586, %599 : vector<16x16xf32>
      %c0_186 = arith.constant 0 : index
      %c0_187 = arith.constant 0 : index
      %601 = vector.load %arg7[%c0_186, %c0_187] : memref<16x16xf32, #tpu.memory_space<vmem>>, vector<16x16xf32>
      tpu.vector_store %arg7[%c0_186, %c0_187], %600 {strides = array<i32>} : memref<16x16xf32, #tpu.memory_space<vmem>>, vector<16x16xf32>,
      %602 = vector.broadcast %cst_3 : f32 to vector<16x16xf32>
      %c0_i32_188 = arith.constant 0 : i32
      %603 = arith.sitofp %c0_i32_188 : i32 to f32
      %604 = vector.broadcast %603 : f32 to vector<16x16xf32>
      %605 = arith.subf %18, %604 : vector<16x16xf32>
      %606 = arith.mulf %605, %605 : vector<16x16xf32>
      %607 = arith.index_cast %c0_i32_188 : i32 to index
      %c0_189 = arith.constant 0 : index
      %608 = vector.load %arg7[%607, %c0_189] : memref<16x16xf32, #tpu.memory_space<vmem>>, vector<1x16xf32>
      %609 = vector.broadcast %608 : vector<1x16xf32> to vector<16x16xf32>
      %610 = arith.addf %606, %609 : vector<16x16xf32>
      %611 = arith.minimumf %602, %610 : vector<16x16xf32>
      %c1_i32_190 = arith.constant 1 : i32
      %612 = arith.sitofp %c1_i32_190 : i32 to f32
      %613 = vector.broadcast %612 : f32 to vector<16x16xf32>
      %614 = arith.subf %18, %613 : vector<16x16xf32>
      %615 = arith.mulf %614, %614 : vector<16x16xf32>
      %616 = arith.index_cast %c1_i32_190 : i32 to index
      %c0_191 = arith.constant 0 : index
      %617 = vector.load %arg7[%616, %c0_191] : memref<16x16xf32, #tpu.memory_space<vmem>>, vector<1x16xf32>
      %618 = vector.broadcast %617 : vector<1x16xf32> to vector<16x16xf32>
      %619 = arith.addf %615, %618 : vector<16x16xf32>
      %620 = arith.minimumf %611, %619 : vector<16x16xf32>
      %c2_i32_192 = arith.constant 2 : i32
      %621 = arith.sitofp %c2_i32_192 : i32 to f32
      %622 = vector.broadcast %621 : f32 to vector<16x16xf32>
      %623 = arith.subf %18, %622 : vector<16x16xf32>
      %624 = arith.mulf %623, %623 : vector<16x16xf32>
      %625 = arith.index_cast %c2_i32_192 : i32 to index
      %c0_193 = arith.constant 0 : index
      %626 = vector.load %arg7[%625, %c0_193] : memref<16x16xf32, #tpu.memory_space<vmem>>, vector<1x16xf32>
      %627 = vector.broadcast %626 : vector<1x16xf32> to vector<16x16xf32>
      %628 = arith.addf %624, %627 : vector<16x16xf32>
      %629 = arith.minimumf %620, %628 : vector<16x16xf32>
      %c3_i32_194 = arith.constant 3 : i32
      %630 = arith.sitofp %c3_i32_194 : i32 to f32
      %631 = vector.broadcast %630 : f32 to vector<16x16xf32>
      %632 = arith.subf %18, %631 : vector<16x16xf32>
      %633 = arith.mulf %632, %632 : vector<16x16xf32>
      %634 = arith.index_cast %c3_i32_194 : i32 to index
      %c0_195 = arith.constant 0 : index
      %635 = vector.load %arg7[%634, %c0_195] : memref<16x16xf32, #tpu.memory_space<vmem>>, vector<1x16xf32>
      %636 = vector.broadcast %635 : vector<1x16xf32> to vector<16x16xf32>
      %637 = arith.addf %633, %636 : vector<16x16xf32>
      %638 = arith.minimumf %629, %637 : vector<16x16xf32>
      %c4_i32_196 = arith.constant 4 : i32
      %639 = arith.sitofp %c4_i32_196 : i32 to f32
      %640 = vector.broadcast %639 : f32 to vector<16x16xf32>
      %641 = arith.subf %18, %640 : vector<16x16xf32>
      %642 = arith.mulf %641, %641 : vector<16x16xf32>
      %643 = arith.index_cast %c4_i32_196 : i32 to index
      %c0_197 = arith.constant 0 : index
      %644 = vector.load %arg7[%643, %c0_197] : memref<16x16xf32, #tpu.memory_space<vmem>>, vector<1x16xf32>
      %645 = vector.broadcast %644 : vector<1x16xf32> to vector<16x16xf32>
      %646 = arith.addf %642, %645 : vector<16x16xf32>
      %647 = arith.minimumf %638, %646 : vector<16x16xf32>
      %c5_i32_198 = arith.constant 5 : i32
      %648 = arith.sitofp %c5_i32_198 : i32 to f32
      %649 = vector.broadcast %648 : f32 to vector<16x16xf32>
      %650 = arith.subf %18, %649 : vector<16x16xf32>
      %651 = arith.mulf %650, %650 : vector<16x16xf32>
      %652 = arith.index_cast %c5_i32_198 : i32 to index
      %c0_199 = arith.constant 0 : index
      %653 = vector.load %arg7[%652, %c0_199] : memref<16x16xf32, #tpu.memory_space<vmem>>, vector<1x16xf32>
      %654 = vector.broadcast %653 : vector<1x16xf32> to vector<16x16xf32>
      %655 = arith.addf %651, %654 : vector<16x16xf32>
      %656 = arith.minimumf %647, %655 : vector<16x16xf32>
      %c6_i32_200 = arith.constant 6 : i32
      %657 = arith.sitofp %c6_i32_200 : i32 to f32
      %658 = vector.broadcast %657 : f32 to vector<16x16xf32>
      %659 = arith.subf %18, %658 : vector<16x16xf32>
      %660 = arith.mulf %659, %659 : vector<16x16xf32>
      %661 = arith.index_cast %c6_i32_200 : i32 to index
      %c0_201 = arith.constant 0 : index
      %662 = vector.load %arg7[%661, %c0_201] : memref<16x16xf32, #tpu.memory_space<vmem>>, vector<1x16xf32>
      %663 = vector.broadcast %662 : vector<1x16xf32> to vector<16x16xf32>
      %664 = arith.addf %660, %663 : vector<16x16xf32>
      %665 = arith.minimumf %656, %664 : vector<16x16xf32>
      %c7_i32_202 = arith.constant 7 : i32
      %666 = arith.sitofp %c7_i32_202 : i32 to f32
      %667 = vector.broadcast %666 : f32 to vector<16x16xf32>
      %668 = arith.subf %18, %667 : vector<16x16xf32>
      %669 = arith.mulf %668, %668 : vector<16x16xf32>
      %670 = arith.index_cast %c7_i32_202 : i32 to index
      %c0_203 = arith.constant 0 : index
      %671 = vector.load %arg7[%670, %c0_203] : memref<16x16xf32, #tpu.memory_space<vmem>>, vector<1x16xf32>
      %672 = vector.broadcast %671 : vector<1x16xf32> to vector<16x16xf32>
      %673 = arith.addf %669, %672 : vector<16x16xf32>
      %674 = arith.minimumf %665, %673 : vector<16x16xf32>
      %c8_i32_204 = arith.constant 8 : i32
      %675 = arith.sitofp %c8_i32_204 : i32 to f32
      %676 = vector.broadcast %675 : f32 to vector<16x16xf32>
      %677 = arith.subf %18, %676 : vector<16x16xf32>
      %678 = arith.mulf %677, %677 : vector<16x16xf32>
      %679 = arith.index_cast %c8_i32_204 : i32 to index
      %c0_205 = arith.constant 0 : index
      %680 = vector.load %arg7[%679, %c0_205] : memref<16x16xf32, #tpu.memory_space<vmem>>, vector<1x16xf32>
      %681 = vector.broadcast %680 : vector<1x16xf32> to vector<16x16xf32>
      %682 = arith.addf %678, %681 : vector<16x16xf32>
      %683 = arith.minimumf %674, %682 : vector<16x16xf32>
      %c9_i32_206 = arith.constant 9 : i32
      %684 = arith.sitofp %c9_i32_206 : i32 to f32
      %685 = vector.broadcast %684 : f32 to vector<16x16xf32>
      %686 = arith.subf %18, %685 : vector<16x16xf32>
      %687 = arith.mulf %686, %686 : vector<16x16xf32>
      %688 = arith.index_cast %c9_i32_206 : i32 to index
      %c0_207 = arith.constant 0 : index
      %689 = vector.load %arg7[%688, %c0_207] : memref<16x16xf32, #tpu.memory_space<vmem>>, vector<1x16xf32>
      %690 = vector.broadcast %689 : vector<1x16xf32> to vector<16x16xf32>
      %691 = arith.addf %687, %690 : vector<16x16xf32>
      %692 = arith.minimumf %683, %691 : vector<16x16xf32>
      %c10_i32_208 = arith.constant 10 : i32
      %693 = arith.sitofp %c10_i32_208 : i32 to f32
      %694 = vector.broadcast %693 : f32 to vector<16x16xf32>
      %695 = arith.subf %18, %694 : vector<16x16xf32>
      %696 = arith.mulf %695, %695 : vector<16x16xf32>
      %697 = arith.index_cast %c10_i32_208 : i32 to index
      %c0_209 = arith.constant 0 : index
      %698 = vector.load %arg7[%697, %c0_209] : memref<16x16xf32, #tpu.memory_space<vmem>>, vector<1x16xf32>
      %699 = vector.broadcast %698 : vector<1x16xf32> to vector<16x16xf32>
      %700 = arith.addf %696, %699 : vector<16x16xf32>
      %701 = arith.minimumf %692, %700 : vector<16x16xf32>
      %c11_i32_210 = arith.constant 11 : i32
      %702 = arith.sitofp %c11_i32_210 : i32 to f32
      %703 = vector.broadcast %702 : f32 to vector<16x16xf32>
      %704 = arith.subf %18, %703 : vector<16x16xf32>
      %705 = arith.mulf %704, %704 : vector<16x16xf32>
      %706 = arith.index_cast %c11_i32_210 : i32 to index
      %c0_211 = arith.constant 0 : index
      %707 = vector.load %arg7[%706, %c0_211] : memref<16x16xf32, #tpu.memory_space<vmem>>, vector<1x16xf32>
      %708 = vector.broadcast %707 : vector<1x16xf32> to vector<16x16xf32>
      %709 = arith.addf %705, %708 : vector<16x16xf32>
      %710 = arith.minimumf %701, %709 : vector<16x16xf32>
      %c12_i32_212 = arith.constant 12 : i32
      %711 = arith.sitofp %c12_i32_212 : i32 to f32
      %712 = vector.broadcast %711 : f32 to vector<16x16xf32>
      %713 = arith.subf %18, %712 : vector<16x16xf32>
      %714 = arith.mulf %713, %713 : vector<16x16xf32>
      %715 = arith.index_cast %c12_i32_212 : i32 to index
      %c0_213 = arith.constant 0 : index
      %716 = vector.load %arg7[%715, %c0_213] : memref<16x16xf32, #tpu.memory_space<vmem>>, vector<1x16xf32>
      %717 = vector.broadcast %716 : vector<1x16xf32> to vector<16x16xf32>
      %718 = arith.addf %714, %717 : vector<16x16xf32>
      %719 = arith.minimumf %710, %718 : vector<16x16xf32>
      %c13_i32_214 = arith.constant 13 : i32
      %720 = arith.sitofp %c13_i32_214 : i32 to f32
      %721 = vector.broadcast %720 : f32 to vector<16x16xf32>
      %722 = arith.subf %18, %721 : vector<16x16xf32>
      %723 = arith.mulf %722, %722 : vector<16x16xf32>
      %724 = arith.index_cast %c13_i32_214 : i32 to index
      %c0_215 = arith.constant 0 : index
      %725 = vector.load %arg7[%724, %c0_215] : memref<16x16xf32, #tpu.memory_space<vmem>>, vector<1x16xf32>
      %726 = vector.broadcast %725 : vector<1x16xf32> to vector<16x16xf32>
      %727 = arith.addf %723, %726 : vector<16x16xf32>
      %728 = arith.minimumf %719, %727 : vector<16x16xf32>
      %c14_i32_216 = arith.constant 14 : i32
      %729 = arith.sitofp %c14_i32_216 : i32 to f32
      %730 = vector.broadcast %729 : f32 to vector<16x16xf32>
      %731 = arith.subf %18, %730 : vector<16x16xf32>
      %732 = arith.mulf %731, %731 : vector<16x16xf32>
      %733 = arith.index_cast %c14_i32_216 : i32 to index
      %c0_217 = arith.constant 0 : index
      %734 = vector.load %arg7[%733, %c0_217] : memref<16x16xf32, #tpu.memory_space<vmem>>, vector<1x16xf32>
      %735 = vector.broadcast %734 : vector<1x16xf32> to vector<16x16xf32>
      %736 = arith.addf %732, %735 : vector<16x16xf32>
      %737 = arith.minimumf %728, %736 : vector<16x16xf32>
      %c15_i32_218 = arith.constant 15 : i32
      %738 = arith.sitofp %c15_i32_218 : i32 to f32
      %739 = vector.broadcast %738 : f32 to vector<16x16xf32>
      %740 = arith.subf %18, %739 : vector<16x16xf32>
      %741 = arith.mulf %740, %740 : vector<16x16xf32>
      %742 = arith.index_cast %c15_i32_218 : i32 to index
      %c0_219 = arith.constant 0 : index
      %743 = vector.load %arg7[%742, %c0_219] : memref<16x16xf32, #tpu.memory_space<vmem>>, vector<1x16xf32>
      %744 = vector.broadcast %743 : vector<1x16xf32> to vector<16x16xf32>
      %745 = arith.addf %741, %744 : vector<16x16xf32>
      %746 = arith.minimumf %737, %745 : vector<16x16xf32>
      %c16_i32_220 = arith.constant 16 : i32
      %747 = math.sqrt %746 : vector<16x16xf32>
      %c15_i32_221 = arith.constant 15 : i32
      %748 = vector.broadcast %c15_i32_221 : i32 to vector<16x16xi32>
      %749 = arith.cmpi slt, %17, %748 : vector<16x16xi32>
      %c15_i32_222 = arith.constant 15 : i32
      %750 = tpu.dynamic_rotate %25 by %c15_i32_222 dim 1 : vector<16x16xf32>, i32 -> vector<16x16xf32>
      %cst_223 = arith.constant 0.000000e+00 : f32
      %751 = vector.broadcast %cst_223 : f32 to vector<16x16xf32>
      %752 = arith.select %749, %750, %751 : vector<16x16xi1>, vector<16x16xf32>
      %c0_i32_224 = arith.constant 0 : i32
      %753 = vector.broadcast %c0_i32_224 : i32 to vector<16x16xi32>
      %754 = arith.cmpi sgt, %17, %753 : vector<16x16xi32>
      %c1_i32_225 = arith.constant 1 : i32
      %755 = tpu.dynamic_rotate %25 by %c1_i32_225 dim 1 : vector<16x16xf32>, i32 -> vector<16x16xf32>
      %cst_226 = arith.constant 0.000000e+00 : f32
      %756 = vector.broadcast %cst_226 : f32 to vector<16x16xf32>
      %757 = arith.select %754, %755, %756 : vector<16x16xi1>, vector<16x16xf32>
      %758 = arith.addf %752, %757 : vector<16x16xf32>
      %c15_i32_227 = arith.constant 15 : i32
      %759 = vector.broadcast %c15_i32_227 : i32 to vector<16x16xi32>
      %760 = arith.cmpi slt, %16, %759 : vector<16x16xi32>
      %c15_i32_228 = arith.constant 15 : i32
      %761 = tpu.dynamic_rotate %25 by %c15_i32_228 dim 0 : vector<16x16xf32>, i32 -> vector<16x16xf32>
      %cst_229 = arith.constant 0.000000e+00 : f32
      %762 = vector.broadcast %cst_229 : f32 to vector<16x16xf32>
      %763 = arith.select %760, %761, %762 : vector<16x16xi1>, vector<16x16xf32>
      %764 = arith.addf %758, %763 : vector<16x16xf32>
      %c0_i32_230 = arith.constant 0 : i32
      %765 = vector.broadcast %c0_i32_230 : i32 to vector<16x16xi32>
      %766 = arith.cmpi sgt, %16, %765 : vector<16x16xi32>
      %c1_i32_231 = arith.constant 1 : i32
      %767 = tpu.dynamic_rotate %25 by %c1_i32_231 dim 0 : vector<16x16xf32>, i32 -> vector<16x16xf32>
      %cst_232 = arith.constant 0.000000e+00 : f32
      %768 = vector.broadcast %cst_232 : f32 to vector<16x16xf32>
      %769 = arith.select %766, %767, %768 : vector<16x16xi1>, vector<16x16xf32>
      %770 = arith.addf %764, %769 : vector<16x16xf32>
      %cst_233 = arith.constant 0.000000e+00 : f32
      %771 = vector.broadcast %cst_233 : f32 to vector<16x16xf32>
      %772 = arith.cmpf ogt, %23, %771 : vector<16x16xf32>
      %cst_234 = arith.constant 0.000000e+00 : f32
      %773 = vector.broadcast %cst_234 : f32 to vector<16x16xf32>
      %774 = arith.cmpf ogt, %770, %773 : vector<16x16xf32>
      %775 = arith.andi %772, %774 : vector<16x16xi1>
      %776 = arith.subf %747, %386 : vector<16x16xf32>
      %cst_235 = arith.constant 0.000000e+00 : f32
      %777 = vector.broadcast %cst_235 : f32 to vector<16x16xf32>
      %778 = arith.select %775, %777, %776 : vector<16x16xi1>, vector<16x16xf32>
      %779 = arith.mulf %778, %15 : vector<16x16xf32>
      %780 = vector.shape_cast %779 : vector<16x16xf32> to vector<1x16x16xf32>
      %cst_236 = arith.constant dense<0.000000e+00> : vector<1xf32>
      %781 = vector.multi_reduction <add>, %780, %cst_236 [1, 2] : vector<1x16x16xf32> to vector<1xf32>
      %782 = vector.shape_cast %781 : vector<1xf32> to vector<1x1x1xf32>
      %783 = vector.extract %782[0, 0, 0] : f32 from vector<1x1x1xf32>
      %cst_237 = arith.constant 3.906250e-03 : f32
      %784 = arith.mulf %783, %cst_237 : f32
      %c0_i32_238 = arith.constant 0 : i32
      %785 = vector.broadcast %c0_i32_238 : i32 to vector<1x128xi32>
      %786 = arith.cmpi eq, %0, %785 : vector<1x128xi32>
      %cst_239 = arith.constant 0.000000e+00 : f32
      %787 = vector.broadcast %784 : f32 to vector<1x128xf32>
      %788 = vector.broadcast %cst_239 : f32 to vector<1x128xf32>
      %789 = arith.select %786, %787, %788 : vector<1x128xi1>, vector<1x128xf32>
      %c0_240 = arith.constant 0 : index
      %c0_241 = arith.constant 0 : index
      %c0_242 = arith.constant 0 : index
      %c0_243 = arith.constant 0 : index
      %790 = vector.load %arg5[%c0_240, %c0_241, %c0_242, %c0_243] : memref<1x1x1x128xf32, #tpu.memory_space<vmem>>, vector<1x1x1x128xf32>
      %791 = vector.shape_cast %790 : vector<1x1x1x128xf32> to vector<1x128xf32>
      %792 = vector.shape_cast %789 : vector<1x128xf32> to vector<1x1x1x128xf32>
      tpu.vector_store %arg5[%c0_240, %c0_241, %c0_242, %c0_243], %792 {strides = array<i32>} : memref<1x1x1x128xf32, #tpu.memory_space<vmem>>, vector<1x1x1x128xf32>,
    } else {
    }
    return
  }
  func.func @transform_0(%arg0: i32, %arg1: i32, %arg2: memref<2x4xi32, #tpu.memory_space<smem>>) -> (i32, i32, i32, i32) {
    %c0_i32 = arith.constant 0 : i32
    %c0_i32_0 = arith.constant 0 : i32
    %c0_i32_1 = arith.constant 0 : i32
    return %arg0, %arg1, %c0_i32, %c0_i32_0 : i32, i32, i32, i32
  }
  func.func @transform_1(%arg0: i32, %arg1: i32, %arg2: memref<2x4xi32, #tpu.memory_space<smem>>) -> (i32, i32, i32, i32) {
    %c0_i32 = arith.constant 0 : i32
    %c0_i32_0 = arith.constant 0 : i32
    %c0_i32_1 = arith.constant 0 : i32
    return %arg0, %arg1, %c0_i32, %c0_i32_0 : i32, i32, i32, i32
  }
  func.func @transform_2(%arg0: i32, %arg1: i32, %arg2: memref<2x4xi32, #tpu.memory_space<smem>>) -> (i32, i32, i32, i32) {
    %c0_i32 = arith.constant 0 : i32
    %c0_i32_0 = arith.constant 0 : i32
    %c0_i32_1 = arith.constant 0 : i32
    return %arg0, %arg1, %c0_i32, %c0_i32_0 : i32, i32, i32, i32
  }
}

</mosaic_0001>

<bundles_post_ra>
// kernel: mismatch_loss.1
= control target key start
LH: loop header
LB: loop body
LE: loop exit
PB: predicated region body
PF: predicated region fallthrough
CT: control target
= control target key end

     0   :  { %s2514_s0 = inlined_call_operand.vmem [shape: s32[2,4], index: 0, kind: input, shape index: {}]   ;;  %s2515_s1 = inlined_call_operand.vmem [shape: f32[2,4,16,16], index: 1, kind: input, shape index: {}]   ;;  %s2516_s2 = inlined_call_operand.vmem [shape: f32[2,4,16,16], index: 2, kind: input, shape index: {}]   ;;  %s2517_s3 = inlined_call_operand.vmem [shape: f32[2,4,1,128], index: 3, kind: output, shape index: {}]  }
   0x1   :  { %s8_s14 = sshll.u32 %s2514_s0, 4  ;;  %s9_s14 = int_to_ptr.vmem [resolvable:$true] %s8_s14 }
   0x2   :  { %s1521_s15 = scalar_lea.vmem %s9_s14, 32  ;;  %p1526_p1 = scmp.lt.s32.totalorder %s9_s14, %s9_s14 }
   0x3   :  { %p1522_p0 = scmp.ne.s32.totalorder %s9_s14, %s1521_s15  ;;  %p1527_p2 = scmp.lt.s32.totalorder %s1521_s15, %s1521_s15 }
   0x5   :  { %p1528_p3 = por %p1527_p2, %p1526_p1 }
   0x7   :  { %p1529_p4 = pnand %p1528_p3, %p1522_p0 }
   0x9   :  { %1532 = shalt.err (!%p1529_p4)  }
   0xa   :  { %s1575_s16 = smov [#allocation5]  }
   0xb   :  { %11 = dma.vmem_to_smem %s9_s14, 32, %s1575_s16, [#allocation4] }
   0xc   :  { %1553 = dma.done.wait [#allocation4], 32 }
   0xd   :  { %1554 = vsyncadd [#allocation4], 4294967264 }
   0xe   :  { %13 = sfence }
   0xf   :  { %s1617_s17 = smov 0   ;;  %s1619_s18 = smov 0  }
  0x10   :  { %s1621_s19 = smov 0   ;;  %s1623_s0 = smov 0  }
  0x11   :  { %s1625_s20 = smov 0  }
  0x12 LB: > { %s28_s21 = sadd.s32 1, %s1565_s19  ;;  %s31_s22 = sadd.s32 1, %s1569_s0  ;;  %s1573_s20 = sphi %s1625_s20, %s19_s20   ;;  %s1569_s0 = sphi %s1623_s0, %s2633_s0   ;;  %s1565_s19 = sphi %s1621_s19, %s2632_s19   ;;  %s1561_s18 = sphi %s1619_s18, %s2631_s18   ;;  %s1557_s17 = sphi %s1617_s17, %s2630_s17  }
  0x13   : > { %p29_p5 = scmp.ge.s32.totalorder %s28_s21, 4  ;;  %p1372_p6 = scmp.ge.s32.totalorder %s1573_s20, 1 }
  0x14   : > { %p155_p7 = scmp.lt.s32.totalorder %s1573_s20, 9 }
  0x15   : > { %s2635_s21 = smov (%p29_p5, %s28_s21), 0  ;;  %s2637_s22 = smov (!%p29_p5, %s31_s22), %s1569_s0 }
  0x16   : > { %p156_p8 = pnand %p1372_p6, %p155_p7  ;;  %p33_p9 = scmp.ge.s32.totalorder %s2637_s22, 2 }
  0x17   : > { %p192_p10 = scmp.lt.s32.totalorder (!%p156_p8), %s1561_s18, 1  ;;  %p194_p11 = scmp.lt.s32.totalorder (!%p156_p8), %s1557_s17, 3  ;;  %v217_v0 = vlaneseq (!%p156_p8)  ;;  %v1576_v2 = vmov (!%p156_p8), 0.0  }
  0x18   : > { %s2639_s22 = smov (%p33_p9, %s2637_s22), 0  ;;  %159 = sbr.rel (%p156_p8) target bundleno = 819 (0x333), region = 28 }
  0x19   : > { %s220_s23 = sshra.s32 (!%p156_p8), %s1557_s17, 7  ;;  %s225_s24 = sand.u32 (!%p156_p8), 127, %s1557_s17  ;;  %v1657_v1 = vand.u32 (!%p156_p8), 127, %v217_v0 }
  0x1a   : > { %s222_s8 = sadd.s32 (!%p156_p8), %s1561_s18, %s220_s23 }
  0x1b   : > { %s1380_s15 = sshll.u32 (!%p156_p8), %s222_s8, 7 }
  0x1c   : > { %s226_s16 = sadd.s32 (!%p156_p8), %s1380_s15, %s225_s24 }
  0x1f   : > { %s193_s25 = scalar_select %p192_p10, %s1561_s18, 1 }
  0x20   : > { %s2641_s17 = smov (!%p194_p11, %s1557_s17), 3 }
  0x21   : > { %s1374_s26 = sshll.u32 %s193_s25, 3  ;;  %s1379_s27 = sshll.u32 %s193_s25, 2 }
  0x22   : > { %s1373_s28 = sshll.u32 %s2641_s17, 1  ;;  %s215_s29 = sadd.s32 %s1379_s27, %s2641_s17 }
  0x23   : > { %s198_s30 = sadd.s32 %s1374_s26, %s1373_s28  ;;  %s1663_s6 = scalar_lea.vmem %s2517_s3, %s215_s29 }
  0x24   : > { %s1375_s7 = sshll.u32 %s198_s30, 3  ;;  %219 = vst [vmem:[%s1663_s6] sm:$0x1] %v1576_v2  ;;  %s227_s17 = sld [smem:[#allocation5 + %s226_s16]] }
  0x25   : > { %s200_s11 = scalar_lea.vmem %s2515_s1, %s1375_s7  ;;  %s1673_s14 = scalar_lea.vmem %s2516_s2, %s1375_s7 }
  0x2a   : > { %p1381_p12 = scmp.ne.s32.totalorder %s227_s17, 0 }
  0x2c   : > { %231 = sbr.rel (%p1381_p12) target bundleno = 819 (0x333), region = 32 }
  0x33   : > { %v233_v3 = vld [vmem:[%s200_s11 + $0x8] sm:$0xff]  ;;  %v232_v4 = vld [vmem:[%s200_s11] sm:$0xff]  ;;  %v1577_v9 = vmov 0.0   ;;  %s1578_s18 = smov 16   ;;  %vm256_vm2 = vcmask 1047680   ;;  %s1579_s23 = smov 127  }
  0x34   : > { %v1450_v5 = vtrunc.f32 %v233_v3  ;;  %v1448_v6 = vtrunc.f32 %v232_v4  ;;  %s1580_s24 = smov 113   ;;  %s1581_s25 = smov 126   ;;  %vm279_vm3 = vcmp.le.s32.totalorder %v1657_v1, 14  ;;  %vm255_vm4 = vcmp.ge.s32.totalorder %v1657_v1, 1 }
  0x35   : > { %s1582_s26 = smov 114   ;;  %s1583_s27 = smov 125   ;;  %vm303_vm5 = vcmp.le.s32.totalorder %v1657_v1, 13  ;;  %vm2545_vm6 = vcmp.ge.s32.totalorder %v1657_v1, 2  ;;  %vm2534_vm7 = vcmp.le.s32.totalorder %v1657_v1, 12  ;;  %vm2544_vm8 = vcmp.ge.s32.totalorder %v1657_v1, 3 }
  0x36   : > { %v1451_v7 = vcvt.f32.s32 %v1450_v5  ;;  %v1449_v8 = vcvt.f32.s32 %v1448_v6  ;;  %s1584_s28 = smov 115   ;;  %s1585_s29 = smov 124   ;;  %vm2543_vm9 = vcmp.le.s32.totalorder %v1657_v1, 11  ;;  %vm2522_vm10 = vcmp.ge.s32.totalorder %v1657_v1, 4 }
  0x37   : > { %s1586_s30 = smov 116   ;;  %s1587_s4 = smov 123   ;;  %vm2521_vm11 = vcmp.le.s32.totalorder %v1657_v1, 10  ;;  %vm2519_vm12 = vcmp.ge.s32.totalorder %v1657_v1, 5  ;;  %vm2518_vm13 = vcmp.le.s32.totalorder %v1657_v1, 9  ;;  %vm2520_vm14 = vcmp.ge.s32.totalorder %v1657_v1, 6 }
  0x38   : > { %vm244_vm0 = vcmp.ne.s32.totalorder %v1451_v7, 0  ;;  %vm243_vm1 = vcmp.ne.s32.totalorder %v1449_v8, 0  ;;  %s1588_s5 = smov 117   ;;  %s1589_s7 = smov 122   ;;  %vm2523_vm15 = vcmp.le.s32.totalorder %v1657_v1, 8 }
  0x39   : > { %v1675_v10 = vsel %vm244_vm0, 1.0, %v1577_v9  ;;  %v1677_v11 = vsel %vm243_vm1, 1.0, %v1577_v9  ;;  %s1590_s8 = smov 118   ;;  %s1591_s9 = smov 121   ;;  %vm2524_vm0 = vcmp.ge.s32.totalorder %v1657_v1, 7  ;;  %vm2525_vm1 = vcmp.ge.s32.totalorder %v1657_v1, 9 }
  0x3a   : > { %2555 = vst [vmem:[#allocation7_spill] sm:$0xff] %v1675_v10  ;;  %2556 = vst [vmem:[#allocation8_spill] sm:$0xff] %v1677_v11  ;;  %v1680_v12 = vsub.f32 1.0, %v1675_v10  ;;  %v1683_v13 = vsub.f32 1.0, %v1677_v11  ;;  %s1592_s10 = smov 119   ;;  %s1593_s11 = smov 120  }
  0x3c   : > { %2557 = vst [vmem:[#allocation9_spill] sm:$0xff] %v1680_v12  ;;  %2558 = vst [vmem:[#allocation10_spill] sm:$0xff] %v1683_v13  ;;  %v1686_v14 = vmul.f32 1e+09, %v1680_v12  ;;  %v251_v15 = vsub.f32 1.0, %v1683_v13  ;;  %v252_v17 = vsub.f32 1.0, %v1680_v12 }
  0x3d   : > { %v1695_v18 = vmul.f32 1e+09, %v1683_v13 }
  0x3e   : > { %768 = vrot.lane.b32.xlu1 %v1686_v14, %s1578_s18  ;;  %v1690_v16 = vmul.f32 1e+09, %v251_v15  ;;  %v1698_v19 = vmul.f32 1e+09, %v252_v17 }
  0x40   : > { %257 = vrot.lane.b32.xlu0 %v1690_v16, %s1578_s18 }
  0x42   : > { %1183 = vrot.lane.b32.xlu1 %v1680_v12, %s1578_s18 }
  0x44   : > { %765 = vrot.lane.b32.xlu0 %v1695_v18, %s1578_s18 }
  0x46   : > { %260 = vrot.lane.b32.xlu1 %v1698_v19, %s1578_s18 }
  0x48   : > { %1180 = vrot.lane.b32.xlu0 %v1683_v13, %s1578_s18 }
  0xb0   : > { %v769_v20 = vpop.permute.xlu1 %768 }
  0xb1   : > { %v770_v28 = vsel %vm256_vm2, %v769_v20, %v1686_v14 }
  0xb2   : > { %v258_v21 = vpop.permute.xlu0 %257 }
  0xb3   : > { %v259_v30 = vsel %vm256_vm2, %v258_v21, %v1690_v16 }
  0xb4   : > { %v1184_v22 = vpop.permute.xlu1 %1183 }
  0xb5   : > { %v1185_v23 = vsel %vm256_vm2, %v1184_v22, %v1680_v12 }
  0xb6   : > { %1188 = vrot.lane.b32.xlu1 %v1185_v23, %s1578_s18  ;;  %v766_v24 = vpop.permute.xlu0 %765 }
  0xb7   : > { %v767_v25 = vsel %vm256_vm2, %v766_v24, %v1695_v18 }
  0xb8   : > { %v261_v29 = vpop.permute.xlu1 %260 }
  0xb9   : > { %v262_v31 = vsel %vm256_vm2, %v261_v29, %v1698_v19 }
  0xba   : > { %771 = vrot.lane.b32.xlu1 %v767_v25, %s1578_s18  ;;  %v1181_v26 = vpop.permute.xlu0 %1180 }
  0xbb   : > { %v1182_v27 = vsel %vm256_vm2, %v1181_v26, %v1683_v13 }
  0xbc   : > { %1186 = vrot.lane.b32.xlu0 %v1182_v27, %s1578_s18 }
  0xbe   : > { %773 = vrot.lane.b32.xlu1 %v770_v28, %s1578_s18 }
  0xc0   : > { %263 = vrot.lane.b32.xlu0 %v259_v30, %s1578_s18 }
  0xc4   : > { %265 = vrot.lane.b32.xlu0 %v262_v31, %s1578_s18 }
 0x128   : > { %v1715_v32 = vpop.permute.xlu1 %1188 }
 0x129   : > { %v1191_v46 = vsel %vm256_vm2, %v1715_v32, %v1680_v12 }
 0x12c   : > { %v772_v33 = vpop.permute.xlu1 %771 }
 0x12d   : > { %v775_v34 = vsel %vm256_vm2, %v772_v33, %v1695_v18 }
 0x12e   : > { %787 = vrot.lane.b32.xlu1 %v775_v34, %s1579_s23  ;;  %779 = vrot.lane.b32.xlu0 %v775_v34, %s1580_s24  ;;  %v1187_v37 = vpop.permute.xlu0 %1186 }
 0x12f   : > { %v1190_v47 = vsel %vm256_vm2, %v1187_v37, %v1683_v13 }
 0x130   : > { %v774_v35 = vpop.permute.xlu1 %773 }
 0x131   : > { %v776_v36 = vsel %vm256_vm2, %v774_v35, %v1686_v14 }
 0x132   : > { %809 = vrot.lane.b32.xlu1 %v775_v34, %s1581_s25  ;;  %801 = vrot.lane.b32.xlu0 %v775_v34, %s1582_s26  ;;  %v264_v38 = vpop.permute.xlu0 %263 }
 0x133   : > { %v267_v39 = vsel %vm256_vm2, %v264_v38, %v1690_v16 }
 0x136   : > { %831 = vrot.lane.b32.xlu1 %v775_v34, %s1583_s27  ;;  %823 = vrot.lane.b32.xlu0 %v775_v34, %s1584_s28  ;;  %v266_v40 = vpop.permute.xlu0 %265 }
 0x137   : > { %v268_v41 = vsel %vm256_vm2, %v266_v40, %v1698_v19  ;;  %vm2526_vm2 = vcmp.le.s32.totalorder %v1657_v1, 6 }
 0x13a   : > { %853 = vrot.lane.b32.xlu1 %v775_v34, %s1585_s29  ;;  %845 = vrot.lane.b32.xlu0 %v775_v34, %s1586_s30 }
 0x13e   : > { %875 = vrot.lane.b32.xlu1 %v775_v34, %s1587_s4  ;;  %867 = vrot.lane.b32.xlu0 %v775_v34, %s1588_s5 }
 0x142   : > { %897 = vrot.lane.b32.xlu1 %v775_v34, %s1589_s7  ;;  %889 = vrot.lane.b32.xlu0 %v775_v34, %s1590_s8 }
 0x146   : > { %919 = vrot.lane.b32.xlu1 %v775_v34, %s1591_s9  ;;  %911 = vrot.lane.b32.xlu0 %v775_v34, %s1592_s10 }
 0x14a   : > { %933 = vrot.lane.b32.xlu1 %v775_v34, %s1593_s11  ;;  %781 = vrot.lane.b32.xlu0 %v776_v36, %s1580_s24 }
 0x14e   : > { %789 = vrot.lane.b32.xlu1 %v776_v36, %s1579_s23  ;;  %803 = vrot.lane.b32.xlu0 %v776_v36, %s1582_s26 }
 0x152   : > { %811 = vrot.lane.b32.xlu1 %v776_v36, %s1581_s25  ;;  %825 = vrot.lane.b32.xlu0 %v776_v36, %s1584_s28 }
 0x156   : > { %833 = vrot.lane.b32.xlu1 %v776_v36, %s1583_s27  ;;  %847 = vrot.lane.b32.xlu0 %v776_v36, %s1586_s30 }
 0x15a   : > { %855 = vrot.lane.b32.xlu1 %v776_v36, %s1585_s29  ;;  %869 = vrot.lane.b32.xlu0 %v776_v36, %s1588_s5 }
 0x15e   : > { %877 = vrot.lane.b32.xlu1 %v776_v36, %s1587_s4  ;;  %891 = vrot.lane.b32.xlu0 %v776_v36, %s1590_s8 }
 0x162   : > { %899 = vrot.lane.b32.xlu1 %v776_v36, %s1589_s7  ;;  %913 = vrot.lane.b32.xlu0 %v776_v36, %s1592_s10 }
 0x166   : > { %921 = vrot.lane.b32.xlu1 %v776_v36, %s1591_s9  ;;  %271 = vrot.lane.b32.xlu0 %v267_v39, %s1580_s24 }
 0x16a   : > { %280 = vrot.lane.b32.xlu1 %v267_v39, %s1579_s23  ;;  %295 = vrot.lane.b32.xlu0 %v267_v39, %s1582_s26 }
 0x16e   : > { %304 = vrot.lane.b32.xlu1 %v267_v39, %s1581_s25  ;;  %319 = vrot.lane.b32.xlu0 %v267_v39, %s1584_s28 }
 0x172   : > { %328 = vrot.lane.b32.xlu1 %v267_v39, %s1583_s27  ;;  %343 = vrot.lane.b32.xlu0 %v267_v39, %s1586_s30 }
 0x176   : > { %352 = vrot.lane.b32.xlu1 %v267_v39, %s1585_s29  ;;  %367 = vrot.lane.b32.xlu0 %v267_v39, %s1588_s5 }
 0x17a   : > { %376 = vrot.lane.b32.xlu1 %v267_v39, %s1587_s4  ;;  %391 = vrot.lane.b32.xlu0 %v267_v39, %s1590_s8 }
 0x17e   : > { %400 = vrot.lane.b32.xlu1 %v267_v39, %s1589_s7  ;;  %415 = vrot.lane.b32.xlu0 %v267_v39, %s1592_s10 }
 0x182   : > { %424 = vrot.lane.b32.xlu1 %v267_v39, %s1591_s9  ;;  %439 = vrot.lane.b32.xlu0 %v267_v39, %s1593_s11 }
 0x186   : > { %282 = vrot.lane.b32.xlu1 %v268_v41, %s1579_s23  ;;  %273 = vrot.lane.b32.xlu0 %v268_v41, %s1580_s24 }
 0x18a   : > { %306 = vrot.lane.b32.xlu1 %v268_v41, %s1581_s25  ;;  %297 = vrot.lane.b32.xlu0 %v268_v41, %s1582_s26 }
 0x18e   : > { %330 = vrot.lane.b32.xlu1 %v268_v41, %s1583_s27  ;;  %321 = vrot.lane.b32.xlu0 %v268_v41, %s1584_s28 }
 0x192   : > { %354 = vrot.lane.b32.xlu1 %v268_v41, %s1585_s29  ;;  %345 = vrot.lane.b32.xlu0 %v268_v41, %s1586_s30 }
 0x196   : > { %378 = vrot.lane.b32.xlu1 %v268_v41, %s1587_s4  ;;  %369 = vrot.lane.b32.xlu0 %v268_v41, %s1588_s5 }
 0x19a   : > { %402 = vrot.lane.b32.xlu1 %v268_v41, %s1589_s7  ;;  %393 = vrot.lane.b32.xlu0 %v268_v41, %s1590_s8 }
 0x19e   : > { %426 = vrot.lane.b32.xlu1 %v268_v41, %s1591_s9  ;;  %417 = vrot.lane.b32.xlu0 %v268_v41, %s1592_s10 }
 0x1a0   : > { %v1783_v42 = vpop.permute.xlu1 %787  ;;  %v1785_v43 = vpop.permute.xlu0 %779 }
 0x1a1   : > { %v793_v50 = vsel %vm279_vm3, %v1783_v42, 1e+09  ;;  %v785_v51 = vsel %vm255_vm4, %v1785_v43, 1e+09 }
 0x1a2   : > { %935 = vrot.lane.b32.xlu1 %v776_v36, %s1593_s11  ;;  %441 = vrot.lane.b32.xlu0 %v268_v41, %s1593_s11  ;;  %v795_v54 = vmin.f32 %v785_v51, %v793_v50 }
 0x1a4   : > { %v1789_v44 = vpop.permute.xlu1 %809  ;;  %v1791_v45 = vpop.permute.xlu0 %801  ;;  %v797_v62 = vadd.f32 1.0, %v795_v54 }
 0x1a5   : > { %v815_v52 = vsel %vm303_vm5, %v1789_v44, 1e+09  ;;  %v807_v53 = vsel %vm2545_vm6, %v1791_v45, 1e+09 }
 0x1a6   : > { %1196 = vrot.lane.b32.xlu1 %v1191_v46, %s1579_s23  ;;  %1194 = vrot.lane.b32.xlu0 %v1190_v47, %s1579_s23  ;;  %v817_v59 = vmin.f32 %v807_v53, %v815_v52  ;;  %v799_v8 = vmin.f32 %v1695_v18, %v797_v62 }
 0x1a8   : > { %v1804_v48 = vpop.permute.xlu1 %831  ;;  %v1806_v49 = vpop.permute.xlu0 %823  ;;  %v819_v5 = vadd.f32 4.0, %v817_v59 }
 0x1a9   : > { %v837_v57 = vsel %vm2534_vm7, %v1804_v48, 1e+09  ;;  %v829_v58 = vsel %vm2544_vm8, %v1806_v49, 1e+09 }
 0x1aa   : > { %1205 = vrot.lane.b32.xlu1 %v1191_v46, %s1580_s24  ;;  %1203 = vrot.lane.b32.xlu0 %v1190_v47, %s1580_s24  ;;  %v839_v63 = vmin.f32 %v829_v58, %v837_v57  ;;  %v821_v22 = vmin.f32 %v799_v8, %v819_v5 }
 0x1ac   : > { %v1825_v55 = vpop.permute.xlu1 %853  ;;  %v1828_v56 = vpop.permute.xlu0 %845  ;;  %v841_v9 = vadd.f32 9.0, %v839_v63 }
 0x1ad   : > { %v859_v60 = vsel %vm2543_vm9, %v1825_v55, 1e+09  ;;  %v851_v61 = vsel %vm2522_vm10, %v1828_v56, 1e+09  ;;  %vm2532_vm10 = vcmp.ge.s32.totalorder %v1657_v1, 11 }
 0x1ae   : > { %v861_v6 = vmin.f32 %v851_v61, %v859_v60  ;;  %v843_v26 = vmin.f32 %v821_v22, %v841_v9 }
 0x1b0   : > { %v876_v2 = vpop.permute.xlu1 %875  ;;  %v868_v3 = vpop.permute.xlu0 %867  ;;  %v863_v23 = vadd.f32 16.0, %v861_v6 }
 0x1b1   : > { %v881_v4 = vsel %vm2521_vm11, %v876_v2, 1e+09  ;;  %v873_v7 = vsel %vm2519_vm12, %v868_v3, 1e+09  ;;  %vm2527_vm12 = vcmp.le.s32.totalorder %v1657_v1, 5  ;;  %vm2528_vm11 = vcmp.le.s32.totalorder %v1657_v1, 7 }
 0x1b2   : > { %v883_v15 = vmin.f32 %v873_v7, %v881_v4  ;;  %v865_v30 = vmin.f32 %v843_v26, %v863_v23  ;;  %v969_v53 = vsel %vm2532_vm10, %v876_v2, 1e+09  ;;  %vm2533_vm10 = vcmask 130048  }
 0x1b4   : > { %v898_v17 = vpop.permute.xlu1 %897  ;;  %v890_v20 = vpop.permute.xlu0 %889  ;;  %v885_v27 = vadd.f32 25.0, %v883_v15 }
 0x1b5   : > { %v903_v21 = vsel %vm2518_vm13, %v898_v17, 1e+09  ;;  %v895_v24 = vsel %vm2520_vm14, %v890_v20, 1e+09  ;;  %vm2530_vm13 = vcmp.ge.s32.totalorder %v1657_v1, 10  ;;  %vm2529_vm14 = vcmp.ge.s32.totalorder %v1657_v1, 8 }
 0x1b6   : > { %v905_v25 = vmin.f32 %v895_v24, %v903_v21  ;;  %v887_v36 = vmin.f32 %v865_v30, %v885_v27  ;;  %v959_v37 = vsel %vm2530_vm13, %v898_v17, 1e+09  ;;  %v961_v38 = vsel %vm2527_vm12, %v890_v20, 1e+09 }
 0x1b7   : > { %vm507_vm12 = vcmp.le.s32.totalorder %v1657_v1, 2  ;;  %v963_v57 = vmin.f32 %v959_v37, %v961_v38  ;;  %vm528_vm13 = vcmp.ge.s32.totalorder %v1657_v1, 15 }
 0x1b8   : > { %v920_v18 = vpop.permute.xlu1 %919  ;;  %v912_v28 = vpop.permute.xlu0 %911  ;;  %v907_v31 = vadd.f32 36.0, %v905_v25  ;;  %v991_v6 = vsel %vm507_vm12, %v1806_v49, 1e+09  ;;  %v1009_v22 = vsel %vm528_vm13, %v1783_v42, 1e+09 }
 0x1b9   : > { %v925_v29 = vsel %vm2523_vm15, %v920_v18, 1e+09  ;;  %v917_v32 = vsel %vm2524_vm0, %v912_v28, 1e+09  ;;  %v949_v33 = vsel %vm2525_vm1, %v920_v18, 1e+09 }
 0x1ba   : > { %v927_v34 = vmin.f32 %v917_v32, %v925_v29  ;;  %v951_v35 = vsel %vm2526_vm2, %v912_v28, 1e+09  ;;  %vm2531_vm15 = vcmp.le.s32.totalorder %v1657_v1, 4  ;;  %vm492_vm0 = vcmp.ge.s32.totalorder %v1657_v1, 12 }
 0x1bb   : > { %vm495_vm1 = vcmp.le.s32.totalorder %v1657_v1, 3  ;;  %v909_v50 = vmin.f32 %v887_v36, %v907_v31  ;;  %v953_v51 = vmin.f32 %v949_v33, %v951_v35  ;;  %vm504_vm2 = vcmp.ge.s32.totalorder %v1657_v1, 13 }
 0x1bc   : > { %v934_v39 = vpop.permute.xlu1 %933  ;;  %v782_v40 = vpop.permute.xlu0 %781  ;;  %v929_v41 = vadd.f32 49.0, %v927_v34  ;;  %v971_v54 = vsel %vm2531_vm15, %v868_v3, 1e+09  ;;  %v979_v62 = vsel %vm492_vm0, %v1825_v55, 1e+09  ;;  %vm531_vm15 = vcmp.le.s32.totalorder %v1657_v1, 0 }
 0x1bd   : > { %v939_v46 = vsel %vm2529_vm14, %v934_v39, 1e+09  ;;  %v941_v47 = vsel %vm2528_vm11, %v934_v39, 1e+09  ;;  %vm516_vm11 = vcmp.ge.s32.totalorder %v1657_v1, 14  ;;  %vm519_vm14 = vcmp.le.s32.totalorder %v1657_v1, 1 }
 0x1be   : > { %v943_v52 = vmin.f32 %v939_v46, %v941_v47  ;;  %v931_v58 = vmin.f32 %v909_v50, %v929_v41  ;;  %v981_v63 = vsel %vm495_vm1, %v1828_v56, 1e+09  ;;  %v973_v2 = vmin.f32 %v969_v53, %v971_v54 }
 0x1bf   : > { %v955_v3 = vadd.f32 81.0, %v953_v51  ;;  %v989_v5 = vsel %vm504_vm2, %v1804_v48, 1e+09  ;;  %v983_v55 = vmin.f32 %v979_v62, %v981_v63  ;;  %v965_v7 = vadd.f32 100.0, %v963_v57 }
 0x1c0   : > { %v945_v59 = vadd.f32 64.0, %v943_v52  ;;  %v790_v60 = vpop.permute.xlu1 %789  ;;  %v1889_v61 = vpop.permute.xlu0 %803  ;;  %v999_v15 = vsel %vm516_vm11, %v1789_v44, 1e+09  ;;  %v1001_v48 = vsel %vm519_vm14, %v1791_v45, 1e+09  ;;  %v993_v17 = vmin.f32 %v989_v5, %v991_v6 }
 0x1c1   : > { %v975_v20 = vadd.f32 121.0, %v973_v2  ;;  %v794_v49 = vsel %vm279_vm3, %v790_v60, 1e+09  ;;  %v1011_v23 = vsel %vm531_vm15, %v1785_v43, 1e+09  ;;  %v1003_v24 = vmin.f32 %v999_v15, %v1001_v48 }
 0x1c2   : > { %v947_v4 = vmin.f32 %v931_v58, %v945_v59  ;;  %v985_v44 = vadd.f32 144.0, %v983_v55  ;;  %v786_v45 = vsel %vm255_vm4, %v782_v40, 1e+09  ;;  %v1013_v28 = vmin.f32 %v1009_v22, %v1011_v23 }
 0x1c3   : > { %v796_v18 = vmin.f32 %v786_v45, %v794_v49  ;;  %v995_v29 = vadd.f32 169.0, %v993_v17  ;;  %v1005_v31 = vadd.f32 196.0, %v1003_v24  ;;  %v1010_v42 = vsel %vm528_vm13, %v790_v60, 1e+09 }
 0x1c4   : > { %v957_v56 = vmin.f32 %v947_v4, %v955_v3  ;;  %v812_v8 = vpop.permute.xlu1 %811  ;;  %v1907_v9 = vpop.permute.xlu0 %825  ;;  %v1934_v35 = vshrl.u32 %v217_v0, 7  ;;  %v1015_v36 = vadd.f32 225.0, %v1013_v28  ;;  %v1012_v38 = vsel %vm531_vm15, %v782_v40, 1e+09 }
 0x1c5   : > { %v798_v34 = vadd.f32 1.0, %v796_v18  ;;  %v816_v39 = vsel %vm303_vm5, %v812_v8, 1e+09  ;;  %v1014_v41 = vmin.f32 %v1010_v42, %v1012_v38  ;;  %v808_v47 = vsel %vm2545_vm6, %v1889_v61, 1e+09 }
 0x1c6   : > { %v967_v21 = vmin.f32 %v957_v56, %v965_v7  ;;  %2559 = vst [vmem:[#allocation11_spill] sm:$0xff] %v1934_v35  ;;  %v818_v52 = vmin.f32 %v808_v47, %v816_v39  ;;  %v1949_v53 = vadd.s32 8, %v1934_v35  ;;  %v1000_v54 = vsel %vm516_vm11, %v812_v8, 1e+09 }
 0x1c7   : > { %v800_v0 = vmin.f32 %v1686_v14, %v798_v34  ;;  %v1016_v40 = vadd.f32 225.0, %v1014_v41  ;;  %v1959_v59 = vcvt.s32.f32 %v1934_v35  ;;  %v1002_v14 = vsel %vm519_vm14, %v1889_v61, 1e+09 }
 0x1c8   : > { %v977_v25 = vmin.f32 %v967_v21, %v975_v20  ;;  %v834_v26 = vpop.permute.xlu1 %833  ;;  %v1925_v27 = vpop.permute.xlu0 %847  ;;  %2560 = vst [vmem:[#allocation12_spill] sm:$0xff] %v1949_v53  ;;  %v820_v62 = vadd.f32 4.0, %v818_v52  ;;  %v1967_v2 = vcvt.s32.f32 %v1949_v53  ;;  %v1004_v3 = vmin.f32 %v1000_v54, %v1002_v14 }
 0x1c9   : > { %v822_v60 = vmin.f32 %v800_v0, %v1016_v40  ;;  %v838_v63 = vsel %vm2534_vm7, %v834_v26, 1e+09  ;;  %v830_v4 = vsel %vm2544_vm8, %v1907_v9, 1e+09  ;;  %v1385_v55 = vadd.f32 -1.0, %v1959_v59 }
 0x1ca   : > { %v987_v30 = vmin.f32 %v977_v25, %v985_v44  ;;  %v840_v56 = vmin.f32 %v830_v4, %v838_v63  ;;  %v1386_v61 = vadd.f32 -1.0, %v1967_v2  ;;  %v1006_v8 = vadd.f32 196.0, %v1004_v3 }
 0x1cb   : > { %v844_v7 = vmin.f32 %v822_v60, %v820_v62  ;;  %v1980_v15 = vmul.f32 %v1959_v59, %v1959_v59  ;;  %v1388_v48 = vadd.f32 -2.0, %v1959_v59  ;;  %v1389_v17 = vadd.f32 -2.0, %v1967_v2 }
 0x1cc   : > { %v997_v32 = vmin.f32 %v987_v30, %v995_v29  ;;  %v1929_v33 = vpop.permute.xlu1 %855  ;;  %v1931_v43 = vpop.permute.xlu0 %869  ;;  %v990_v20 = vsel %vm504_vm2, %v834_v26, 1e+09  ;;  %v1992_v22 = vmul.f32 %v1967_v2, %v1967_v2  ;;  %v1994_v23 = vmul.f32 %v1385_v55, %v1385_v55 }
 0x1cd   : > { %v1391_v24 = vadd.f32 -3.0, %v1959_v59  ;;  %v866_v44 = vmin.f32 %v844_v7, %v1006_v8  ;;  %v842_v25 = vadd.f32 9.0, %v840_v56  ;;  %v1392_v45 = vadd.f32 -3.0, %v1967_v2 }
 0x1ce   : > { %v1007_v37 = vmin.f32 %v997_v32, %v1005_v31  ;;  %v1394_v18 = vadd.f32 -4.0, %v1959_v59  ;;  %v992_v26 = vsel %vm507_vm12, %v1907_v9, 1e+09  ;;  %v860_v28 = vsel %vm2543_vm9, %v1929_v33, 1e+09 }
 0x1cf   : > { %v1395_v29 = vadd.f32 -4.0, %v1967_v2  ;;  %v1397_v30 = vadd.f32 -5.0, %v1959_v59  ;;  %v994_v31 = vmin.f32 %v990_v20, %v992_v26  ;;  %v2007_v32 = vmul.f32 %v1386_v61, %v1386_v61 }
 0x1d0   : > { %v1017_v46 = vmin.f32 %v1007_v37, %v1015_v36  ;;  %v1943_v50 = vpop.permute.xlu1 %877  ;;  %v1945_v51 = vpop.permute.xlu0 %891  ;;  %v2009_v42 = vmul.f32 %v1388_v48, %v1388_v48  ;;  %v1398_v34 = vadd.f32 -5.0, %v1967_v2  ;;  %v1400_v38 = vadd.f32 -6.0, %v1959_v59 }
 0x1d1   : > { %v1401_v39 = vadd.f32 -6.0, %v1967_v2  ;;  %v1403_v41 = vadd.f32 -7.0, %v1959_v59  ;;  %v2022_v0 = vmul.f32 %v1389_v17, %v1389_v17  ;;  %v2024_v52 = vmul.f32 %v1391_v24, %v1391_v24 }
 0x1d2   : > { %1019 = vst.msk [vmem:[#allocation3] sm:$0xff] %vm2533_vm10, %v1017_v46  ;;  %vm2561_vm10 = vcmp.ge.s32.totalorder %v1657_v1, 4  ;;  %v888_v46 = vmin.f32 %v866_v44, %v842_v25  ;;  %v2026_v40 = vmul.f32 %v1392_v45, %v1392_v45  ;;  %v2028_v54 = vmul.f32 %v1394_v18, %v1394_v18 }
 0x1d3   : > { %v852_v36 = vsel %vm2561_vm10, %v1925_v27, 1e+09  ;;  %v2030_v60 = vmul.f32 %v1395_v29, %v1395_v29  ;;  %v2032_v62 = vmul.f32 %v1397_v30, %v1397_v30  ;;  %v996_v14 = vadd.f32 169.0, %v994_v31 }
 0x1d4   : > { %v1954_v57 = vpop.permute.xlu1 %899  ;;  %v1956_v58 = vpop.permute.xlu0 %913  ;;  %v862_v47 = vmin.f32 %v852_v36, %v860_v28  ;;  %v2037_v3 = vmul.f32 %v1398_v34, %v1398_v34  ;;  %v1404_v4 = vadd.f32 -7.0, %v1967_v2  ;;  %v980_v55 = vsel %vm492_vm0, %v1929_v33, 1e+09 }
 0x1d5   : > { %v2047_v61 = vmul.f32 %v1400_v38, %v1400_v38  ;;  %v2049_v8 = vmul.f32 %v1401_v39, %v1401_v39  ;;  %v2051_v48 = vmul.f32 %v1403_v41, %v1403_v41  ;;  %v910_v17 = vmin.f32 %v888_v46, %v996_v14 }
 0x1d6   : > { %v864_v20 = vadd.f32 16.0, %v862_v47  ;;  %v982_v44 = vsel %vm495_vm1, %v1925_v27, 1e+09  ;;  %v1406_v45 = vadd.f32 -8.0, %v1959_v59  ;;  %v1407_v18 = vadd.f32 -8.0, %v1967_v2 }
 0x1d7   : > { %v984_v26 = vmin.f32 %v980_v55, %v982_v44  ;;  %vm2562_vm10 = vcmp.le.s32.totalorder %v1657_v1, 10  ;;  %v2077_v36 = vmul.f32 %v1404_v4, %v1404_v4  ;;  %v1409_v38 = vadd.f32 -9.0, %v1959_v59 }
 0x1d8   : > { %v1972_v5 = vpop.permute.xlu1 %921  ;;  %v1974_v6 = vpop.permute.xlu0 %271  ;;  %v882_v28 = vsel %vm2562_vm10, %v1943_v50, 1e+09  ;;  %v1410_v39 = vadd.f32 -9.0, %v1967_v2  ;;  %v932_v41 = vmin.f32 %v910_v17, %v864_v20  ;;  %vm2564_vm10 = vcmp.ge.s32.totalorder %v1657_v1, 5 }
 0x1d9   : > { %v277_v24 = vsel %vm255_vm4, %v1974_v6, 1e+09  ;;  %2563 = vst [vmem:[#allocation13_spill] sm:$0xff] %v2077_v36  ;;  %v874_v46 = vsel %vm2564_vm10, %v1931_v43, 1e+09  ;;  %v2096_v20 = vmul.f32 %v1406_v45, %v1406_v45  ;;  %v2098_v44 = vmul.f32 %v1407_v18, %v1407_v18 }
 0x1da   : > { %v2100_v35 = vmul.f32 %v1409_v38, %v1409_v38  ;;  %vm2569_vm10 = vcmp.ge.s32.totalorder %v1657_v1, 11  ;;  %v2136_v12 = vmul.f32 %v1410_v39, %v1410_v39 }
 0x1db   : > { %2566 = vst [vmem:[#allocation14_spill] sm:$0xff] %v2096_v20  ;;  %2567 = vst [vmem:[#allocation15_spill] sm:$0xff] %v2098_v44 }
 0x1dc   : > { %v1986_v21 = vpop.permute.xlu1 %280  ;;  %v1988_v49 = vpop.permute.xlu0 %295  ;;  %2568 = vst [vmem:[#allocation16_spill] sm:$0xff] %v2100_v35  ;;  %2577 = vst [vmem:[#allocation17_spill] sm:$0xff] %v2136_v12 }
 0x1dd   : > { %v286_v63 = vsel %vm279_vm3, %v1986_v21, 1e+09  ;;  %v301_v29 = vsel %vm2545_vm6, %v1988_v49, 1e+09  ;;  %vm2573_vm6 = vcmp.ge.s32.totalorder %v1657_v1, 6 }
 0x1de   : > { %v288_v25 = vmin.f32 %v277_v24, %v286_v63  ;;  %v884_v63 = vmin.f32 %v874_v46, %v882_v28  ;;  %v2091_v24 = vadd.f32 -10.0, %v1959_v59 }
 0x1e0   : > { %v2015_v9 = vpop.permute.xlu1 %304  ;;  %v2017_v37 = vpop.permute.xlu0 %319  ;;  %v290_v4 = vadd.f32 1.0, %v288_v25  ;;  %v2103_v25 = vadd.f32 -10.0, %v1967_v2 }
 0x1e1   : > { %v310_v33 = vsel %vm303_vm5, %v2015_v9, 1e+09  ;;  %v325_v47 = vsel %vm2544_vm8, %v2017_v37, 1e+09  ;;  %vm2572_vm8 = vcmp.le.s32.totalorder %v1657_v1, 4 }
 0x1e2   : > { %v312_v31 = vmin.f32 %v301_v29, %v310_v33  ;;  %v986_v33 = vadd.f32 144.0, %v984_v26  ;;  %v970_v26 = vsel %vm2569_vm10, %v1943_v50, 1e+09  ;;  %v896_v50 = vsel %vm2573_vm6, %v1945_v51, 1e+09 }
 0x1e4   : > { %v2043_v7 = vpop.permute.xlu1 %328  ;;  %v2045_v56 = vpop.permute.xlu0 %343  ;;  %v314_v29 = vadd.f32 4.0, %v312_v31  ;;  %v948_v28 = vmin.f32 %v932_v41, %v986_v33  ;;  %v292_v31 = vmin.f32 %v1690_v16, %v290_v4  ;;  %v972_v41 = vsel %vm2572_vm8, %v1931_v43, 1e+09 }
 0x1e5   : > { %v334_v30 = vsel %vm2534_vm7, %v2043_v7, 1e+09  ;;  %vm2565_vm7 = vcmp.ge.s32.totalorder %v1657_v1, 4  ;;  %v974_v33 = vmin.f32 %v970_v26, %v972_v41  ;;  %vm2575_vm8 = vcmp.ge.s32.totalorder %v1657_v1, 10 }
 0x1e6   : > { %v336_v55 = vmin.f32 %v325_v47, %v334_v30  ;;  %v349_v17 = vsel %vm2565_vm7, %v2045_v56, 1e+09  ;;  %vm2570_vm7 = vcmp.ge.s32.totalorder %v1657_v1, 5  ;;  %v886_v30 = vadd.f32 25.0, %v884_v63 }
 0x1e7   : > { %v2121_v47 = vadd.f32 -11.0, %v1959_v59  ;;  %v316_v63 = vmin.f32 %v292_v31, %v314_v29  ;;  %v960_v43 = vsel %vm2575_vm8, %v1954_v57, 1e+09  ;;  %vm2580_vm8 = vcmp.le.s32.totalorder %v1657_v1, 6 }
 0x1e8   : > { %v2073_v27 = vpop.permute.xlu1 %352  ;;  %v2075_v34 = vpop.permute.xlu0 %367  ;;  %v338_v38 = vadd.f32 9.0, %v336_v55  ;;  %v958_v26 = vmin.f32 %v948_v28, %v886_v30  ;;  %v2149_v31 = vsel %vm2580_vm8, %v1956_v58, 1e+09  ;;  %v976_v39 = vadd.f32 121.0, %v974_v33 }
 0x1e9   : > { %v358_v14 = vsel %vm2543_vm9, %v2073_v27, 1e+09  ;;  %v373_v45 = vsel %vm2570_vm7, %v2075_v34, 1e+09  ;;  %vm2571_vm9 = vcmp.le.s32.totalorder %v1657_v1, 10  ;;  %vm2578_vm7 = vcmp.le.s32.totalorder %v1657_v1, 5 }
 0x1ea   : > { %v360_v10 = vmin.f32 %v349_v17, %v358_v14  ;;  %v2124_v14 = vadd.f32 -11.0, %v1967_v2  ;;  %v340_v41 = vmin.f32 %v316_v63, %v338_v38  ;;  %vm2585_vm8 = vcmp.le.s32.totalorder %v1657_v1, 7 }
 0x1ec   : > { %v377_v11 = vpop.permute.xlu1 %376  ;;  %v392_v53 = vpop.permute.xlu0 %391  ;;  %v362_v4 = vadd.f32 16.0, %v360_v10  ;;  %v962_v10 = vsel %vm2578_vm7, %v1945_v51, 1e+09  ;;  %v1430_v51 = vld [vmem:[#allocation3] ss:$0 sm:$0xff]  ;;  %vm2583_vm7 = vcmp.ge.s32.totalorder %v1657_v1, 9 }
 0x1ed   : > { %v382_v18 = vsel %vm2571_vm9, %v377_v11, 1e+09  ;;  %vm2574_vm9 = vcmp.le.s32.totalorder %v1657_v1, 9 }
 0x1ee   : > { %v384_v46 = vmin.f32 %v373_v45, %v382_v18  ;;  %v904_v16 = vsel %vm2574_vm9, %v1954_v57, 1e+09  ;;  %v397_v45 = vsel %vm2573_vm6, %v392_v53, 1e+09  ;;  %vm2576_vm10 = vmmov %vm2574_vm9  ;;  %vm2579_vm9 = vcmp.ge.s32.totalorder %v1657_v1, 7 }
 0x1ef   : > { %v906_v29 = vmin.f32 %v896_v50, %v904_v16  ;;  %v2144_v57 = vsel %vm2579_vm9, %v1956_v58, 1e+09  ;;  %v364_v28 = vmin.f32 %v340_v41, %v362_v4  ;;  %vm2581_vm6 = vmmov %vm2579_vm9  ;;  %v964_v50 = vmin.f32 %v960_v43, %v962_v10 }
 0x1f0   : > { %v401_v55 = vpop.permute.xlu1 %400  ;;  %v416_v17 = vpop.permute.xlu0 %415  ;;  %v386_v13 = vadd.f32 25.0, %v384_v46  ;;  %vm2584_vm9 = vcmp.ge.s32.totalorder %v1657_v1, 8 }
 0x1f1   : > { %v406_v18 = vsel %vm2576_vm10, %v401_v55, 1e+09  ;;  %v421_v38 = vsel %vm2581_vm6, %v416_v17, 1e+09  ;;  %vm2582_vm10 = vcmp.le.s32.totalorder %v1657_v1, 8  ;;  %v2163_v41 = vadd.f32 36.0, %v906_v29 }
 0x1f2   : > { %v408_v35 = vmin.f32 %v397_v45, %v406_v18  ;;  %v2159_v18 = vmin.f32 %v958_v26, %v976_v39  ;;  %v388_v33 = vmin.f32 %v364_v28, %v386_v13  ;;  %vm2586_vm6 = vcmp.ge.s32.totalorder %v1657_v1, 10 }
 0x1f3   : > { %v469_v43 = vsel %vm2586_vm6, %v401_v55, 1e+09  ;;  %v1026_v13 = vadd.f32 %v1430_v51, %v1980_v15  ;;  %v966_v39 = vadd.f32 100.0, %v964_v50  ;;  %v1027_v28 = vadd.f32 %v1430_v51, %v1992_v22 }
 0x1f4   : > { %v410_v30 = vadd.f32 36.0, %v408_v35  ;;  %v425_v46 = vpop.permute.xlu1 %424  ;;  %v440_v63 = vpop.permute.xlu0 %439  ;;  %vm2591_vm6 = vcmp.ge.s32.totalorder %v1657_v1, 9  ;;  %v2195_v51 = vmul.f32 %v2091_v24, %v2091_v24  ;;  %v496_v24 = vsel %vm495_vm1, %v2045_v56, 1e+09 }
 0x1f5   : > { %v430_v16 = vsel %vm2582_vm10, %v425_v46, 1e+09  ;;  %v457_v45 = vsel %vm2583_vm7, %v425_v46, 1e+09  ;;  %v445_v58 = vsel %vm2584_vm9, %v440_v63, 1e+09 }
 0x1f6   : > { %v432_v35 = vmin.f32 %v421_v38, %v430_v16  ;;  %v448_v4 = vsel %vm2585_vm8, %v440_v63, 1e+09  ;;  %vm2587_vm10 = vcmp.le.s32.totalorder %v1657_v1, 6  ;;  %v412_v46 = vmin.f32 %v388_v33, %v410_v30  ;;  %v1431_v33 = vld [vmem:[#allocation3 + $0x1] ss:$0 sm:$0xff] }
 0x1f7   : > { %v460_v10 = vsel %vm2587_vm10, %v416_v17, 1e+09  ;;  %v450_v12 = vmin.f32 %v445_v58, %v448_v4  ;;  %vm2588_vm7 = vcmp.ge.s32.totalorder %v1657_v1, 11  ;;  %vm2589_vm9 = vcmp.le.s32.totalorder %v1657_v1, 5 }
 0x1f8   : > { %v434_v44 = vadd.f32 49.0, %v432_v35  ;;  %v462_v20 = vmin.f32 %v457_v45, %v460_v10  ;;  %v2169_v36 = vpop.permute.xlu1 %282  ;;  %v2171_v26 = vpop.permute.xlu0 %273  ;;  %v481_v29 = vsel %vm2588_vm7, %v377_v11, 1e+09  ;;  %v472_v55 = vsel %vm2589_vm9, %v392_v53, 1e+09 }
 0x1f9   : > { %vm2590_vm8 = vcmp.le.s32.totalorder %v1657_v1, 8  ;;  %v474_v30 = vmin.f32 %v469_v43, %v472_v55  ;;  %v452_v63 = vadd.f32 64.0, %v450_v12  ;;  %v2185_v16 = vsel %vm2591_vm6, %v1972_v5, 1e+09 }
 0x1fa   : > { %v926_v17 = vsel %vm2590_vm8, %v1972_v5, 1e+09  ;;  %v436_v38 = vmin.f32 %v412_v46, %v434_v44  ;;  %v493_v11 = vsel %vm492_vm0, %v2073_v27, 1e+09  ;;  %vm2592_vm10 = vcmp.le.s32.totalorder %v1657_v1, 4 }
 0x1fb   : > { %v484_v53 = vsel %vm2592_vm10, %v2075_v34, 1e+09  ;;  %v464_v44 = vadd.f32 81.0, %v462_v20  ;;  %v1028_v5 = vmin.f32 %v1026_v13, 1e+09  ;;  %v978_v27 = vmin.f32 %v2159_v18, %v2163_v41 }
 0x1fc   : > { %v486_v50 = vmin.f32 %v481_v29, %v484_v53  ;;  %v454_v12 = vmin.f32 %v436_v38, %v452_v63  ;;  %v2197_v45 = vpop.permute.xlu1 %306  ;;  %v2199_v58 = vpop.permute.xlu0 %297  ;;  %v505_v34 = vsel %vm504_vm2, %v2043_v7, 1e+09  ;;  %v1029_v35 = vmin.f32 %v1027_v28, 1e+09 }
 0x1fd   : > { %v517_v20 = vsel %vm516_vm11, %v2015_v9, 1e+09  ;;  %v498_v4 = vmin.f32 %v493_v11, %v496_v24  ;;  %v476_v43 = vadd.f32 100.0, %v474_v30  ;;  %v529_v18 = vsel %vm528_vm13, %v1986_v21, 1e+09 }
 0x1fe   : > { %v466_v10 = vmin.f32 %v454_v12, %v464_v44  ;;  %v508_v7 = vsel %vm507_vm12, %v2017_v37, 1e+09  ;;  %v1035_v41 = vadd.f32 %v1431_v33, %v1994_v23  ;;  %v1036_v56 = vadd.f32 %v1431_v33, %v2007_v32  ;;  %v1432_v21 = vld [vmem:[#allocation3 + $0x2] ss:$0 sm:$0xff] }
 0x1ff   : > { %v520_v46 = vsel %vm519_vm14, %v1988_v49, 1e+09  ;;  %v510_v9 = vmin.f32 %v505_v34, %v508_v7  ;;  %v488_v13 = vadd.f32 121.0, %v486_v50  ;;  %v532_v37 = vsel %vm531_vm15, %v1974_v6, 1e+09 }
 0x200   : > { %v478_v29 = vmin.f32 %v466_v10, %v476_v43  ;;  %v2223_v55 = vpop.permute.xlu1 %330  ;;  %v2225_v28 = vpop.permute.xlu0 %321  ;;  %v522_v30 = vmin.f32 %v517_v20, %v520_v46  ;;  %v1037_v38 = vmin.f32 %v1028_v5, %v1035_v41  ;;  %v1038_v63 = vmin.f32 %v1029_v35, %v1036_v56  ;;  %v1433_v34 = vld [vmem:[#allocation3 + $0x3] ss:$0 sm:$0xff] }
 0x201   : > { %v500_v11 = vadd.f32 144.0, %v498_v4  ;;  %v287_v49 = vsel %vm279_vm3, %v2169_v36, 1e+09  ;;  %v278_v50 = vsel %vm255_vm4, %v2171_v26, 1e+09  ;;  %v928_v44 = vmin.f32 %v2144_v57, %v926_v17 }
 0x202   : > { %v490_v53 = vmin.f32 %v478_v29, %v488_v13  ;;  %v534_v12 = vmin.f32 %v529_v18, %v532_v37  ;;  %v1044_v33 = vadd.f32 %v1432_v21, %v2009_v42  ;;  %v1045_v6 = vadd.f32 %v1432_v21, %v2022_v0 }
 0x203   : > { %v512_v5 = vadd.f32 169.0, %v510_v9  ;;  %v311_v35 = vsel %vm303_vm5, %v2197_v45, 1e+09  ;;  %vm2593_vm3 = vcmp.ge.s32.totalorder %v1657_v1, 2  ;;  %v988_v57 = vmin.f32 %v978_v27, %v966_v39 }
 0x204   : > { %v502_v24 = vmin.f32 %v490_v53, %v500_v11  ;;  %v302_v20 = vsel %vm2593_vm3, %v2199_v58, 1e+09  ;;  %v2245_v4 = vpop.permute.xlu1 %354  ;;  %v2247_v43 = vpop.permute.xlu0 %345  ;;  %v524_v17 = vadd.f32 196.0, %v522_v30  ;;  %v289_v10 = vmin.f32 %v278_v50, %v287_v49 }
 0x205   : > { %v1046_v18 = vmin.f32 %v1037_v38, %v1044_v33  ;;  %vm2594_vm4 = vcmp.le.s32.totalorder %v1657_v1, 12  ;;  %vm2595_vm5 = vcmp.ge.s32.totalorder %v1657_v1, 3  ;;  %v1047_v46 = vmin.f32 %v1038_v63, %v1045_v6 }
 0x206   : > { %v514_v7 = vmin.f32 %v502_v24, %v512_v5  ;;  %v335_v41 = vsel %vm2594_vm4, %v2223_v55, 1e+09  ;;  %v326_v56 = vsel %vm2595_vm5, %v2225_v28, 1e+09  ;;  %v930_v9 = vadd.f32 49.0, %v928_v44 }
 0x207   : > { %v313_v13 = vmin.f32 %v302_v20, %v311_v35  ;;  %v1053_v29 = vadd.f32 %v1433_v34, %v2024_v52  ;;  %v1054_v21 = vadd.f32 %v1433_v34, %v2026_v40  ;;  %v536_v39 = vadd.f32 225.0, %v534_v12  ;;  %v1434_v44 = vld [vmem:[#allocation3 + $0x4] ss:$0 sm:$0xff] }
 0x208   : > { %v526_v27 = vmin.f32 %v514_v7, %v524_v17  ;;  %vm2596_vm7 = vcmp.le.s32.totalorder %v1657_v1, 11  ;;  %vm2597_vm9 = vcmp.ge.s32.totalorder %v1657_v1, 4  ;;  %v2263_v38 = vpop.permute.xlu1 %378  ;;  %v2265_v11 = vpop.permute.xlu0 %369  ;;  %v954_v63 = vmin.f32 %v2185_v16, %v2149_v31 }
 0x209   : > { %v359_v37 = vsel %vm2596_vm7, %v2245_v4, 1e+09  ;;  %v350_v30 = vsel %vm2597_vm9, %v2247_v43, 1e+09  ;;  %v291_v53 = vadd.f32 1.0, %v289_v10  ;;  %v337_v49 = vmin.f32 %v326_v56, %v335_v41 }
 0x20a   : > { %v1055_v50 = vmin.f32 %v1046_v18, %v1053_v29  ;;  %v538_v12 = vmin.f32 %v526_v27, %v536_v39  ;;  %vm2598_vm8 = vcmp.le.s32.totalorder %v1657_v1, 10  ;;  %vm2599_vm6 = vcmp.ge.s32.totalorder %v1657_v1, 5  ;;  %v1435_v41 = vld [vmem:[#allocation3 + $0x5] ss:$0 sm:$0xff] }
 0x20b   : > { %v383_v33 = vsel %vm2598_vm8, %v2263_v38, 1e+09  ;;  %v374_v6 = vsel %vm2599_vm6, %v2265_v11, 1e+09  ;;  %v1056_v34 = vmin.f32 %v1047_v46, %v1054_v21  ;;  %v315_v5 = vadd.f32 4.0, %v313_v13 }
 0x20c   : > { %v361_v24 = vmin.f32 %v350_v30, %v359_v37  ;;  %v2277_v35 = vmul.f32 %v2103_v25, %v2103_v25  ;;  %v2281_v31 = vmul.f32 %v2121_v47, %v2121_v47  ;;  %v998_v16 = vmin.f32 %v988_v57, %v930_v9  ;;  %v403_v20 = vpop.permute.xlu1 %402  ;;  %v394_v17 = vpop.permute.xlu0 %393  ;;  %v1436_v57 = vld [vmem:[#allocation3 + $0x6] ss:$0 sm:$0xff] }
 0x20d   : > { %vm2600_vm10 = vcmask 130048   ;;  %v2286_v10 = vmul.f32 %v2124_v14, %v2124_v14  ;;  %v1062_v18 = vadd.f32 %v1434_v44, %v2028_v54  ;;  %v1063_v7 = vadd.f32 %v1434_v44, %v2030_v60 }
 0x20e   : > { %541 = vst.msk [vmem:[#allocation2] sm:$0xff] %vm2600_vm10, %v538_v12  ;;  %v293_v25 = vmin.f32 %v1698_v19, %v291_v53  ;;  %v339_v56 = vadd.f32 9.0, %v337_v49  ;;  %v385_v46 = vmin.f32 %v374_v6, %v383_v33  ;;  %vm2601_vm3 = vcmp.le.s32.totalorder %v1657_v1, 9 }
 0x20f   : > { %v407_v47 = vsel %vm2601_vm3, %v403_v20, 1e+09  ;;  %v956_v9 = vadd.f32 81.0, %v954_v63  ;;  %vm2602_vm4 = vcmp.ge.s32.totalorder %v1657_v1, 6  ;;  %v1064_v29 = vmin.f32 %v1055_v50, %v1062_v18 }
 0x210   : > { %v398_v13 = vsel %vm2602_vm4, %v394_v17, 1e+09  ;;  %v1065_v14 = vmin.f32 %v1056_v34, %v1063_v7  ;;  %v317_v21 = vmin.f32 %v293_v25, %v315_v5  ;;  %v363_v39 = vadd.f32 16.0, %v361_v24  ;;  %v427_v19 = vpop.permute.xlu1 %426  ;;  %v418_v53 = vpop.permute.xlu0 %417 }
 0x211   : > { %v409_v27 = vmin.f32 %v398_v13, %v407_v47  ;;  %v2296_v37 = vadd.f32 -12.0, %v1959_v59  ;;  %v1008_v30 = vmin.f32 %v998_v16, %v956_v9  ;;  %v1071_v49 = vadd.f32 %v1435_v41, %v2032_v62 }
 0x212   : > { %v1072_v44 = vadd.f32 %v1435_v41, %v2037_v3  ;;  %v2301_v63 = vadd.f32 %v1436_v57, %v2047_v61  ;;  %v341_v12 = vmin.f32 %v317_v21, %v339_v56  ;;  %v387_v33 = vadd.f32 25.0, %v385_v46 }
 0x213   : > { %vm2603_vm5 = vcmp.le.s32.totalorder %v1657_v1, 8  ;;  %v2306_v6 = vadd.f32 %v1436_v57, %v2049_v8  ;;  %vm2604_vm7 = vcmp.ge.s32.totalorder %v1657_v1, 10  ;;  %vm2605_vm9 = vcmp.ge.s32.totalorder %v1657_v1, 7 }
 0x214   : > { %v431_v50 = vsel %vm2603_vm5, %v427_v19, 1e+09  ;;  %v470_v34 = vsel %vm2604_vm7, %v403_v20, 1e+09  ;;  %v422_v5 = vsel %vm2605_vm9, %v418_v53, 1e+09  ;;  %v2312_v24 = vmin.f32 %v1064_v29, %v1071_v49  ;;  %v936_v47 = vpop.permute.xlu1 %935  ;;  %v442_v57 = vpop.permute.xlu0 %441 }
 0x215   : > { %v2314_v16 = vmin.f32 %v1065_v14, %v1072_v44  ;;  %v365_v18 = vmin.f32 %v341_v12, %v363_v39  ;;  %v411_v7 = vadd.f32 36.0, %v409_v27  ;;  %vm2606_vm8 = vcmp.le.s32.totalorder %v1657_v1, 5  ;;  %v1384_v56 = vld [vmem:[#allocation2] ss:$0 sm:$0xff]  ;;  %v1387_v29 = vld [vmem:[#allocation2 + $0x1] ss:$0 sm:$0xff] }
 0x216   : > { %v473_v41 = vsel %vm2606_vm8, %v394_v17, 1e+09  ;;  %v433_v25 = vmin.f32 %v422_v5, %v431_v50  ;;  %vm2607_vm6 = vcmp.ge.s32.totalorder %v1657_v1, 9  ;;  %vm2608_vm10 = vcmp.le.s32.totalorder %v1657_v1, 6 }
 0x217   : > { %v458_v46 = vsel %vm2607_vm6, %v427_v19, 1e+09  ;;  %v461_v20 = vsel %vm2608_vm10, %v418_v53, 1e+09  ;;  %v550_v9 = vadd.f32 %v1384_v56, %v1980_v15  ;;  %v551_v13 = vadd.f32 %v1384_v56, %v1992_v22 }
 0x218   : > { %v389_v14 = vmin.f32 %v365_v18, %v387_v33  ;;  %v435_v21 = vadd.f32 49.0, %v433_v25  ;;  %vm2609_vm3 = vcmp.ge.s32.totalorder %v1657_v1, 8  ;;  %vm2610_vm4 = vcmp.le.s32.totalorder %v1657_v1, 7 }
 0x219   : > { %v940_v17 = vsel %vm2609_vm3, %v936_v47, 1e+09  ;;  %v942_v39 = vsel %vm2610_vm4, %v936_v47, 1e+09  ;;  %vm2611_vm5 = vmmov %vm2609_vm3  ;;  %v552_v49 = vmin.f32 %v550_v9, 1e+09  ;;  %v463_v44 = vmin.f32 %v458_v46, %v461_v20 }
 0x21a   : > { %v944_v27 = vmin.f32 %v940_v17, %v942_v39  ;;  %v446_v19 = vsel %vm2611_vm5, %v442_v57, 1e+09  ;;  %vm2612_vm7 = vmmov %vm2610_vm4  ;;  %v413_v15 = vmin.f32 %v389_v14, %v411_v7  ;;  %v553_v12 = vmin.f32 %v551_v13, 1e+09  ;;  %v1390_v7 = vld [vmem:[#allocation2 + $0x2] ss:$0 sm:$0xff] }
 0x21b   : > { %v449_v53 = vsel %vm2612_vm7, %v442_v57, 1e+09  ;;  %vm2613_vm9 = vcmp.ge.s32.totalorder %v1657_v1, 11  ;;  %vm2614_vm8 = vcmp.le.s32.totalorder %v1657_v1, 4  ;;  %v563_v18 = vadd.f32 %v1387_v29, %v1994_v23  ;;  %v1393_v17 = vld [vmem:[#allocation2 + $0x3] ss:$0 sm:$0xff] }
 0x21c   : > { %v451_v22 = vmin.f32 %v446_v19, %v449_v53  ;;  %v482_v33 = vsel %vm2613_vm9, %v2263_v38, 1e+09  ;;  %v485_v50 = vsel %vm2614_vm8, %v2265_v11, 1e+09  ;;  %v946_v5 = vadd.f32 64.0, %v944_v27 }
 0x21d   : > { %v475_v25 = vmin.f32 %v470_v34, %v473_v41  ;;  %v437_v56 = vmin.f32 %v413_v15, %v435_v21  ;;  %v564_v57 = vadd.f32 %v1387_v29, %v2007_v32  ;;  %v494_v46 = vsel %vm492_vm0, %v2245_v4, 1e+09 }
 0x21e   : > { %v453_v47 = vadd.f32 64.0, %v451_v22  ;;  %v497_v38 = vsel %vm495_vm1, %v2247_v43, 1e+09  ;;  %v1018_v20 = vmin.f32 %v1008_v30, %v946_v5  ;;  %v565_v9 = vmin.f32 %v552_v49, %v563_v18  ;;  %v1437_v49 = vld [vmem:[#allocation3 + $0x7] ss:$0 sm:$0xff] }
 0x21f   : > { %v487_v11 = vmin.f32 %v482_v33, %v485_v50  ;;  %v465_v13 = vadd.f32 81.0, %v463_v44  ;;  %v566_v23 = vmin.f32 %v553_v12, %v564_v57  ;;  %v530_v34 = vsel %vm528_vm13, %v2169_v36, 1e+09  ;;  %v1396_v33 = vld [vmem:[#allocation2 + $0x4] ss:$0 sm:$0xff] }
 0x220   : > { %v455_v14 = vmin.f32 %v437_v56, %v453_v47  ;;  %v506_v32 = vsel %vm504_vm2, %v2223_v55, 1e+09  ;;  %v509_v4 = vsel %vm507_vm12, %v2225_v28, 1e+09  ;;  %v576_v43 = vadd.f32 %v1390_v7, %v2009_v42 }
 0x221   : > { %vm2615_vm0 = vcmask 130048   ;;  %v499_v30 = vmin.f32 %v494_v46, %v497_v38  ;;  %v477_v41 = vadd.f32 100.0, %v475_v25  ;;  %v577_v21 = vadd.f32 %v1390_v7, %v2022_v0  ;;  %v2616_v25 = vld [vmem:[#allocation13_spill] sm:$0xff]  ;;  %v2617_v38 = vld [vmem:[#allocation14_spill] sm:$0xff] }
 0x222   : > { %1020 = vst.msk [vmem:[#allocation3 + $0x8] sm:$0xff] %vm2615_vm0, %v1018_v20  ;;  %v467_v29 = vmin.f32 %v455_v14, %v465_v13  ;;  %v533_v36 = vsel %vm531_vm15, %v2171_v26, 1e+09  ;;  %v518_v55 = vsel %vm516_vm11, %v2197_v45, 1e+09  ;;  %v578_v28 = vmin.f32 %v565_v9, %v576_v43  ;;  %v2618_v14 = vld [vmem:[#allocation15_spill] sm:$0xff]  ;;  %vm2621_vm11 = vmmov %vm2615_vm0 }
 0x223   : > { %v521_v42 = vsel %vm519_vm14, %v2199_v58, 1e+09  ;;  %v511_v39 = vmin.f32 %v506_v32, %v509_v4  ;;  %v489_v27 = vadd.f32 121.0, %v487_v11  ;;  %v579_v53 = vmin.f32 %v566_v23, %v577_v21  ;;  %v1399_v13 = vld [vmem:[#allocation2 + $0x5] ss:$0 sm:$0xff] }
 0x224   : > { %v479_v19 = vmin.f32 %v467_v29, %v477_v41  ;;  %v589_v0 = vadd.f32 %v1393_v17, %v2024_v52  ;;  %v1419_v15 = vadd.f32 -12.0, %v1967_v2  ;;  %v1082_v26 = vmin.f32 %v2312_v24, %v2301_v63 }
 0x225   : > { %v1083_v45 = vmin.f32 %v2314_v16, %v2306_v6  ;;  %v523_v44 = vmin.f32 %v518_v55, %v521_v42  ;;  %v501_v22 = vadd.f32 144.0, %v499_v30  ;;  %v590_v58 = vadd.f32 %v1393_v17, %v2026_v40  ;;  %v2619_v30 = vld [vmem:[#allocation16_spill] sm:$0xff]  ;;  %v2620_v17 = vld [vmem:[#allocation17_spill] sm:$0xff] }
 0x226   : > { %v491_v12 = vmin.f32 %v479_v19, %v489_v27  ;;  %v535_v50 = vmin.f32 %v530_v34, %v533_v36  ;;  %v591_v5 = vmin.f32 %v578_v28, %v589_v0  ;;  %v1089_v18 = vadd.f32 %v1437_v49, %v2051_v48 }
 0x227   : > { %v1090_v52 = vadd.f32 %v1437_v49, %v2616_v25  ;;  %v513_v56 = vadd.f32 169.0, %v511_v39  ;;  %v592_v57 = vmin.f32 %v579_v53, %v590_v58  ;;  %v1421_v63 = vadd.f32 -13.0, %v1959_v59 }
 0x228   : > { %v503_v47 = vmin.f32 %v491_v12, %v501_v22  ;;  %v602_v6 = vadd.f32 %v1396_v33, %v2028_v54  ;;  %v1091_v16 = vmin.f32 %v1082_v26, %v1089_v18  ;;  %v525_v20 = vadd.f32 196.0, %v523_v44  ;;  %v1402_v26 = vld [vmem:[#allocation2 + $0x6] ss:$0 sm:$0xff] }
 0x229   : > { %v1438_v24 = vld [vmem:[#allocation3 + $0x8] ss:$0 sm:$0xff]  ;;  %v1439_v7 = vld [vmem:[#allocation3 + $0x9] ss:$0 sm:$0xff]  ;;  %v1092_v46 = vmin.f32 %v1083_v45, %v1090_v52  ;;  %v603_v11 = vadd.f32 %v1396_v33, %v2030_v60  ;;  %v1440_v34 = vld [vmem:[#allocation3 + $0xa] ss:$0 sm:$0xff]  ;;  %v615_v42 = vadd.f32 %v1399_v13, %v2032_v62  ;;  %v2386_v60 = vmul.f32 %v2296_v37, %v2296_v37 }
 0x22a   : > { %v1098_v40 = vadd.f32 %v1438_v24, %v2617_v38  ;;  %v515_v9 = vmin.f32 %v503_v47, %v513_v56  ;;  %v1099_v23 = vadd.f32 %v1438_v24, %v2618_v14  ;;  %v537_v32 = vadd.f32 225.0, %v535_v50  ;;  %v1441_v55 = vld [vmem:[#allocation3 + $0xb] ss:$0 sm:$0xff]  ;;  %v1442_v0 = vld [vmem:[#allocation3 + $0xc] ss:$0 sm:$0xff] }
 0x22b   : > { %v604_v4 = vmin.f32 %v591_v5, %v602_v6  ;;  %v1107_v41 = vadd.f32 %v1439_v7, %v2619_v30  ;;  %v605_v21 = vmin.f32 %v592_v57, %v603_v11  ;;  %v1108_v36 = vadd.f32 %v1439_v7, %v2620_v17  ;;  %v1443_v47 = vld [vmem:[#allocation3 + $0xd] ss:$0 sm:$0xff]  ;;  %v1405_v57 = vld [vmem:[#allocation2 + $0x7] ss:$0 sm:$0xff] }
 0x22c   : > { %v1100_v43 = vmin.f32 %v1091_v16, %v1098_v40  ;;  %v527_v29 = vmin.f32 %v515_v9, %v525_v20  ;;  %v1101_v54 = vmin.f32 %v1092_v46, %v1099_v23  ;;  %v1116_v39 = vadd.f32 %v1440_v34, %v2195_v51 }
 0x22d   : > { %v616_v19 = vadd.f32 %v1399_v13, %v2037_v3  ;;  %v1117_v49 = vadd.f32 %v1440_v34, %v2277_v35  ;;  %v2391_v45 = vmul.f32 %v1419_v15, %v1419_v15  ;;  %v1422_v44 = vadd.f32 -13.0, %v1967_v2  ;;  %v1444_v13 = vld [vmem:[#allocation3 + $0xe] ss:$0 sm:$0xff] }
 0x22e   : > { %v1109_v28 = vmin.f32 %v1100_v43, %v1107_v41  ;;  %v539_v27 = vmin.f32 %v527_v29, %v537_v32  ;;  %v1110_v53 = vmin.f32 %v1101_v54, %v1108_v36  ;;  %v1125_v22 = vadd.f32 %v1441_v55, %v2281_v31 }
 0x22f   : > { %v617_v37 = vmin.f32 %v604_v4, %v615_v42  ;;  %v618_v12 = vmin.f32 %v605_v21, %v616_v19  ;;  %v1126_v33 = vadd.f32 %v1441_v55, %v2286_v10  ;;  %v2397_v3 = vmul.f32 %v1421_v63, %v1421_v63  ;;  %v1197_v42 = vpop.permute.xlu1 %1196 }
 0x230   : > { %v1118_v62 = vmin.f32 %v1109_v28, %v1116_v39  ;;  %542 = vst.msk [vmem:[#allocation2 + $0x8] sm:$0xff] %vm2621_vm11, %v539_v27  ;;  %v1119_v58 = vmin.f32 %v1110_v53, %v1117_v49  ;;  %v1424_v50 = vadd.f32 -14.0, %v1959_v59  ;;  %v1134_v15 = vadd.f32 %v1442_v0, %v2386_v60  ;;  %v1195_v28 = vpop.permute.xlu0 %1194  ;;  %v1445_v53 = vld [vmem:[#allocation3 + $0xf] ss:$0 sm:$0xff] }
 0x231   : > { %v628_v18 = vadd.f32 %v1402_v26, %v2047_v61  ;;  %v629_v52 = vadd.f32 %v1402_v26, %v2049_v8  ;;  %v2403_v24 = vmul.f32 %v1422_v44, %v1422_v44  ;;  %v1425_v7 = vadd.f32 -14.0, %v1967_v2  ;;  %v2622_v49 = vld [vmem:[#allocation10_spill] sm:$0xff] }
 0x232   : > { %v1127_v5 = vmin.f32 %v1118_v62, %v1125_v22  ;;  %v1128_v56 = vmin.f32 %v1119_v58, %v1126_v33  ;;  %v1135_v6 = vadd.f32 %v1442_v0, %v2391_v45  ;;  %v2407_v40 = vmul.f32 %v1424_v50, %v1424_v50  ;;  %v2623_v33 = vld [vmem:[#allocation9_spill] sm:$0xff] }
 0x233   : > { %v630_v16 = vmin.f32 %v617_v37, %v628_v18  ;;  %v631_v46 = vmin.f32 %v618_v12, %v629_v52  ;;  %v1427_v20 = vadd.f32 -15.0, %v1959_v59  ;;  %v1143_v61 = vadd.f32 %v1443_v47, %v2397_v3 }
 0x234   : > { %v1136_v63 = vmin.f32 %v1127_v5, %v1134_v15  ;;  %v1137_v9 = vmin.f32 %v1128_v56, %v1135_v6  ;;  %v641_v8 = vadd.f32 %v1405_v57, %v2051_v48  ;;  %v642_v11 = vadd.f32 %v1405_v57, %v2616_v25  ;;  %v1206_v57 = vpop.permute.xlu1 %1205 }
 0x235   : > { %v2413_v32 = vmul.f32 %v1425_v7, %v1425_v7  ;;  %v1428_v4 = vadd.f32 -15.0, %v1967_v2  ;;  %v1144_v43 = vadd.f32 %v1443_v47, %v2403_v24  ;;  %v2419_v48 = vmul.f32 %v1427_v20, %v1427_v20  ;;  %v1204_v7 = vpop.permute.xlu0 %1203 }
 0x236   : > { %v1145_v41 = vmin.f32 %v1136_v63, %v1143_v61  ;;  %v643_v29 = vmin.f32 %v630_v16, %v641_v8  ;;  %v644_v21 = vmin.f32 %v631_v46, %v642_v11  ;;  %v1152_v55 = vadd.f32 %v1444_v13, %v2407_v40 }
 0x237   : > { %v1408_v23 = vld [vmem:[#allocation2 + $0x8] ss:$0 sm:$0xff]  ;;  %v1411_v34 = vld [vmem:[#allocation2 + $0x9] ss:$0 sm:$0xff]  ;;  %v1414_v36 = vld [vmem:[#allocation2 + $0xa] ss:$0 sm:$0xff]  ;;  %v1146_v25 = vmin.f32 %v1137_v9, %v1144_v43  ;;  %v739_v26 = vmul.f32 %v1428_v4, %v1428_v4  ;;  %v1161_v5 = vadd.f32 %v1445_v53, %v2419_v48 }
 0x238   : > { %v654_v59 = vadd.f32 %v1408_v23, %v2617_v38  ;;  %v655_v54 = vadd.f32 %v1408_v23, %v2618_v14  ;;  %v667_v2 = vadd.f32 %v1411_v34, %v2619_v30  ;;  %v668_v19 = vadd.f32 %v1411_v34, %v2620_v17  ;;  %v1417_v38 = vld [vmem:[#allocation2 + $0xb] ss:$0 sm:$0xff]  ;;  %v1420_v58 = vld [vmem:[#allocation2 + $0xc] ss:$0 sm:$0xff]  ;;  %v2624_v30 = vld [vmem:[#allocation11_spill] sm:$0xff] }
 0x239   : > { %v1215_v0 = vrot.slane %v2622_v49, 1  ;;  %v1153_v14 = vadd.f32 %v1444_v13, %v2413_v32  ;;  %v1154_v44 = vmin.f32 %v1145_v41, %v1152_v55  ;;  %v680_v37 = vadd.f32 %v1414_v36, %v2195_v51  ;;  %v1426_v46 = vld [vmem:[#allocation2 + $0xe] ss:$0 sm:$0xff]  ;;  %v1429_v43 = vld [vmem:[#allocation2 + $0xf] ss:$0 sm:$0xff] }
 0x23a   : > { %v656_v39 = vmin.f32 %v643_v29, %v654_v59  ;;  %v657_v27 = vmin.f32 %v644_v21, %v655_v54  ;;  %v681_v12 = vadd.f32 %v1414_v36, %v2277_v35  ;;  %v1216_v50 = vrot.slane %v2623_v33, 1  ;;  %v1423_v35 = vld [vmem:[#allocation2 + $0xd] ss:$0 sm:$0xff] }
 0x23b   : > { %vm1217_vm12 = vcmp.lt.s32.totalorder %v2624_v30, 7  ;;  %v1155_v17 = vmin.f32 %v1146_v25, %v1153_v14  ;;  %v693_v52 = vadd.f32 %v1417_v38, %v2281_v31  ;;  %v694_v56 = vadd.f32 %v1417_v38, %v2286_v10  ;;  %v2625_v31 = vld [vmem:[#allocation12_spill] sm:$0xff] }
 0x23c   : > { %v669_v62 = vmin.f32 %v656_v39, %v667_v2  ;;  %v670_v22 = vmin.f32 %v657_v27, %v668_v19  ;;  %vm1179_vm13 = vcmp.lt.s32.totalorder %v1657_v1, 15  ;;  %vm1202_vm14 = vcmp.gt.s32.totalorder %v1657_v1, 0 }
 0x23d   : > { %v706_v51 = vadd.f32 %v1420_v58, %v2386_v60  ;;  %v1162_v47 = vadd.f32 %v1445_v53, %v739_v26  ;;  %v707_v16 = vadd.f32 %v1420_v58, %v2391_v45  ;;  %v2437_v20 = vmin.f32 %v1154_v44, %v1161_v5 }
 0x23e   : > { %v682_v15 = vmin.f32 %v669_v62, %v680_v37  ;;  %v683_v18 = vmin.f32 %v670_v22, %v681_v12  ;;  %vm1214_vm15 = vcmp.lt.s32.totalorder %v2625_v31, 15  ;;  %v1219_v10 = vsel %vm1217_vm12, %v1216_v50, %v1215_v0  ;;  %v2626_v62 = vld [vmem:[#allocation8_spill] sm:$0xff]  ;;  %v2627_v22 = vld [vmem:[#allocation7_spill] sm:$0xff] }
 0x23f   : > { %v1226_v9 = vrot.slane %v2622_v49, 7  ;;  %v2443_v61 = vmin.f32 %v1155_v17, %v1162_v47  ;;  %v719_v11 = vadd.f32 %v1423_v35, %v2397_v3  ;;  %v720_v13 = vadd.f32 %v1423_v35, %v2403_v24  ;;  %v234_v47 = vld [vmem:[%s1673_s14] sm:$0xff] }
 0x240   : > { %v695_v6 = vmin.f32 %v682_v15, %v693_v52  ;;  %v696_v63 = vmin.f32 %v683_v18, %v694_v56  ;;  %v1227_v45 = vrot.slane %v2623_v33, 7  ;;  %v1210_v23 = vsel %vm1202_vm14, %v1206_v57, 0.0 }
 0x241   : > { %v1209_v34 = vsel %vm1202_vm14, %v1204_v7, 0.0  ;;  %v732_v4 = vadd.f32 %v1426_v46, %v2407_v40  ;;  %v733_v21 = vadd.f32 %v1426_v46, %v2413_v32  ;;  %1513 = vrsqrt.f32 %v2437_v20 }
 0x242   : > { %v708_v60 = vmin.f32 %v695_v6, %v706_v51  ;;  %v709_v8 = vmin.f32 %v696_v63, %v707_v16  ;;  %v1201_v3 = vsel %vm1179_vm13, %v1197_v42, 0.0  ;;  %v1200_v24 = vsel %vm1179_vm13, %v1195_v28, 0.0  ;;  %v235_v63 = vld [vmem:[%s1673_s14 + $0x8] sm:$0xff] }
 0x243   : > { %vm1228_vm1 = vcmp.lt.s32.totalorder %v2624_v30, 1  ;;  %1515 = vrsqrt.f32 %v2443_v61  ;;  %v745_v40 = vadd.f32 %v1429_v43, %v2419_v48  ;;  %v746_v36 = vadd.f32 %v1429_v43, %v739_v26 }
 0x244   : > { %v721_v41 = vmin.f32 %v708_v60, %v719_v11  ;;  %v722_v29 = vmin.f32 %v709_v8, %v720_v13  ;;  %v1212_v25 = vadd.f32 %v1210_v23, %v1201_v3  ;;  %v1211_v55 = vadd.f32 %v1209_v34, %v1200_v24 }
 0x245   : > { %v1221_v32 = vsel %vm1214_vm15, %v1219_v10, 0.0  ;;  %v1218_v42 = vsel %vm1217_vm12, %v1215_v0, %v1216_v50  ;;  %vm1224_vm2 = vcmp.gt.s32.totalorder %v2624_v30, 0  ;;  %v1230_v28 = vsel %vm1228_vm1, %v1227_v45, %v1226_v9 }
 0x246   : > { %v734_v59 = vmin.f32 %v721_v41, %v732_v4  ;;  %v735_v54 = vmin.f32 %v722_v29, %v733_v21  ;;  %v1223_v2 = vadd.f32 %v1221_v32, %v1212_v25  ;;  %v1222_v19 = vadd.f32 %v1218_v42, %v1211_v55 }
 0x247   : > { %v1229_v48 = vsel %vm1228_vm1, %v1226_v9, %v1227_v45  ;;  %v1231_v53 = vsel %vm1224_vm2, %v1230_v28, 0.0  ;;  %vm1235_vm3 = vcmp.gt.f32.partialorder %v2626_v62, 0.0  ;;  %vm1236_vm4 = vcmp.gt.f32.partialorder %v2627_v22, 0.0 }
 0x248   : > { %v747_v39 = vmin.f32 %v734_v59, %v745_v40  ;;  %v748_v27 = vmin.f32 %v735_v54, %v746_v36  ;;  %v1234_v26 = vadd.f32 %v1229_v48, %v1223_v2  ;;  %v1233_v14 = vadd.f32 %v1231_v53, %v1222_v19 }
 0x249   : > { %vm1167_vm5 = vcmp.eq.f32.partialorder %v2437_v20, inf  ;;  %vm1169_vm7 = vcmp.eq.f32.partialorder %v2437_v20, 0.0  ;;  %v1170_v12 = vand.u32 2147483648, %v2437_v20  ;;  %vm1174_vm9 = vcmp.eq.f32.partialorder %v2443_v61, inf }
 0x24a   : > { %1517 = vrsqrt.f32 %v747_v39  ;;  %vm1238_vm6 = vcmp.gt.f32.partialorder %v1234_v26, 0.0  ;;  %vm1237_vm10 = vcmp.gt.f32.partialorder %v1233_v14, 0.0  ;;  %vm1176_vm8 = vcmp.eq.f32.partialorder %v2443_v61, 0.0 }
 0x24b   : > { %1519 = vrsqrt.f32 %v748_v27  ;;  %v1514_v49 = vpop.eup %1513  ;;  %v1177_v30 = vand.u32 2147483648, %v2443_v61  ;;  %vm751_vm0 = vcmp.eq.f32.partialorder %v747_v39, inf  ;;  %v754_v17 = vand.u32 2147483648, %v747_v39  ;;  %vm1239_vm14 = vmand %vm1235_vm3, %vm1237_vm10 }
 0x24c   : > { %v1166_v0 = vmul.f32 %v1514_v49, %v2437_v20  ;;  %vm753_vm11 = vcmp.eq.f32.partialorder %v747_v39, 0.0  ;;  %vm758_vm12 = vcmp.eq.f32.partialorder %v748_v27, inf  ;;  %v761_v52 = vand.u32 2147483648, %v748_v27  ;;  %vm1240_vm15 = vmand %vm1236_vm4, %vm1238_vm6 }
 0x24d   : > { %v1516_v38 = vpop.eup %1515  ;;  %vm760_vm13 = vcmp.eq.f32.partialorder %v748_v27, 0.0  ;;  %vm2628_vm1 = vcmask 130048   ;;  %vm1260_vm6 = vcmp.eq.s32.totalorder %v1657_v1, 0 }
 0x24e   : > { %v1173_v44 = vmul.f32 %v1516_v38, %v2443_v61  ;;  %v1168_v50 = vsel %vm1167_vm5, %v2437_v20, %v1166_v0  ;;  %vm2629_vm2 = vmmov %vm2628_vm1 }
 0x24f   : > { %v1171_v35 = vsel %vm1169_vm7, %v1170_v12, %v1168_v50 }
 0x250   : > { %v1175_v15 = vsel %vm1174_vm9, %v2443_v61, %v1173_v44 }
 0x251   : > { %v1178_v7 = vsel %vm1176_vm8, %v1177_v30, %v1175_v15 }
 0x254   : > { %v1518_v37 = vpop.eup %1517 }
 0x255   : > { %v1520_v58 = vpop.eup %1519  ;;  %v750_v33 = vmul.f32 %v1518_v37, %v747_v39 }
 0x256   : > { %v757_v5 = vmul.f32 %v1520_v58, %v748_v27 }
 0x257   : > { %v752_v18 = vsel %vm751_vm0, %v747_v39, %v750_v33 }
 0x258   : > { %v755_v56 = vsel %vm753_vm11, %v754_v17, %v752_v18  ;;  %v759_v51 = vsel %vm758_vm12, %v748_v27, %v757_v5 }
 0x259   : > { %v762_v57 = vsel %vm760_vm13, %v761_v52, %v759_v51  ;;  %v1241_v6 = vsub.f32 %v1171_v35, %v755_v56 }
 0x25a   : > { %v1242_v16 = vsub.f32 %v1178_v7, %v762_v57 }
 0x25b   : > { %v1243_v46 = vsel %vm1239_vm14, 0.0, %v1241_v6 }
 0x25c   : > { %v1244_v31 = vsel %vm1240_vm15, 0.0, %v1242_v16  ;;  %v1245_v20 = vmul.f32 %v1243_v46, %v234_v47 }
 0x25d   : > { %v1246_v10 = vmul.f32 %v1244_v31, %v235_v63 }
 0x25e   : > { %v1247_v9 = vsel %vm2628_vm1, %v1245_v20, 0.0 }
 0x25f   : > { %v1248_v61 = vsel %vm2629_vm2, %v1246_v10, 0.0 }
 0x260   : > { %v1249_v60 = vadd.f32 %v1248_v61, %v1247_v9 }
 0x262   : > { %1250 = vadd.xlane.f32.xlu0 %v1249_v60 }
 0x2ef   : > { %v1251_v8 = vpop.xlane.xlu0 %1250 }
 0x2f0   : > { %v1252_v11 = vrot.slane %v1251_v8, 4 }
 0x2f2   : > { %v1253_v13 = vadd.f32 %v1252_v11, %v1251_v8 }
 0x2f4   : > { %v1254_v45 = vrot.slane %v1253_v13, 2 }
 0x2f6   : > { %v1255_v23 = vadd.f32 %v1254_v45, %v1253_v13 }
 0x2f8   : > { %v1256_v34 = vrot.slane %v1255_v23, 1 }
 0x2fa   : > { %v1257_v4 = vadd.f32 %v1256_v34, %v1255_v23 }
 0x2fc   : > { %1452 = vpush %v1257_v4 }
 0x32d   : > { %s1453_s12 = spop %1452 }
 0x32e   : > { %s1259_s13 = smul.f32 0.00390625, %s1453_s12 }
 0x330   : > { %v1261_v43 = vstv %s1259_s13 }
 0x331   : > { %v1262_v41 = vsel %vm1260_vm6, %v1261_v43, 0.0 }
 0x332   : > { %1263 = vst [vmem:[%s1663_s6] sm:$0x1] %v1262_v41 }
 0x333 PF: > { %s19_s20 = sadd.s32 1, %s1573_s20   ;;  %s2630_s17 = smov %s1565_s19 }
 0x334   : > { %p16_p13 = scmp.ge.s32.totalorder %s19_s20, 10   ;;  %s2631_s18 = smov %s1569_s0 }
 0x335   : > { %s2632_s19 = smov %s2635_s21  ;;  %s2633_s0 = smov %s2639_s22 }
 0x336   :  { %18 = sbr.rel (!%p16_p13) target bundleno = 18 (0x12), region = 65 }

</bundles_post_ra>
